<compile_context>
chip_gen: v6e
topology: v6e:2x2x1
jax: 0.10.0
libtpu: 0.0.40
codegen_flags: <defaults>
</compile_context>

<pallas_src>
import functools

import jax
import jax.numpy as jnp
import numpy as np
from jax import lax
from jax.experimental import pallas as pl
from jax.experimental.pallas import tpu as pltpu

HIGHEST = jax.lax.Precision.HIGHEST          # reference only


def _vmem_limit_bytes():
    """Per-generation VMEM budget (v7x: 64 MiB physical -> leave headroom;
    v5e/v6e: 128 MiB physical -> use most of it)."""
    try:
        kind = jax.devices()[0].device_kind.lower()
    except Exception:
        kind = ""
    if any(tag in kind for tag in ("v3", "v4", "v5", "v6")):
        return 100 * 1024 * 1024
    return 48 * 1024 * 1024                  # v7x / unknown: stay conservative


_VMEM_LIMIT = _vmem_limit_bytes()


def _round_up(x, m):
    return ((x + m - 1) // m) * m


def _aligned_divisor_tile(dim, target, align):
    """Largest multiple-of-`align` divisor of `dim` that is <= target; small
    dims are used whole; only falls back to the full dim when nothing aligns."""
    if dim <= target:
        return dim
    t = (target // align) * align
    while t >= align:
        if dim % t == 0:
            return t
        t -= align
    return dim


# ----------------------------------------------------------------------------
# Tiled linear kernel:  y[j] = x @ w[j] + b[j]     (stacked over j)
# ----------------------------------------------------------------------------
def _linear_kernel(x_ref, w_ref, b_ref, o_ref, acc_ref):
    k = pl.program_id(3)

    @pl.when(k == 0)
    def _():
        acc_ref[...] = jnp.zeros_like(acc_ref)

    acc_ref[...] += jnp.dot(x_ref[...], w_ref[0],
                            preferred_element_type=jnp.float32)

    @pl.when(k == pl.num_programs(3) - 1)
    def _():
        o_ref[0] = (acc_ref[...] + b_ref[0]).astype(o_ref.dtype)


def linear_stacked(x, w_t, b, out_dtype):
    """x: [M, K]; w_t: [J, K, N] (pre-transposed weights); b: [J, 1, N]."""
    m_dim, k_dim = x.shape
    j_dim, _, n_dim = w_t.shape

    # M is zero-padded up to the tile instead of silently using the full dim.
    tm = 256 if m_dim >= 256 else _round_up(m_dim, 8)
    m_pad = _round_up(m_dim, tm)
    if m_pad != m_dim:
        x = jnp.pad(x, ((0, m_pad - m_dim), (0, 0)))
    tn = _aligned_divisor_tile(n_dim, 512, 128)
    tk = _aligned_divisor_tile(k_dim, 1024, 128)

    grid = (j_dim, m_pad // tm, n_dim // tn, k_dim // tk)
    out = pl.pallas_call(
        _linear_kernel,
        grid=grid,
        in_specs=[
            pl.BlockSpec((tm, tk), lambda j, m, n, k: (m, k)),
            pl.BlockSpec((1, tk, tn), lambda j, m, n, k: (j, k, n)),
            pl.BlockSpec((1, 1, tn), lambda j, m, n, k: (j, 0, n)),
        ],
        out_specs=pl.BlockSpec((1, tm, tn), lambda j, m, n, k: (j, m, n)),
        out_shape=jax.ShapeDtypeStruct((j_dim, m_pad, n_dim), out_dtype),
        scratch_shapes=[pltpu.VMEM((tm, tn), jnp.float32)],
        compiler_params=pltpu.CompilerParams(
            dimension_semantics=("parallel", "parallel", "parallel",
                                 "arbitrary"),
            vmem_limit_bytes=_VMEM_LIMIT),
    )(x.astype(jnp.bfloat16), w_t.astype(jnp.bfloat16), b.astype(jnp.float32))
    return out[:, :m_dim, :]


# ----------------------------------------------------------------------------
# Fused attention kernel (one (batch, head) pair per grid step):
#   AC = scale*(q + r_w_bias) @ k^T
#   BD = scale*(q + r_r_bias) @ r_ext^T   (extra zero row -> shift pad for free)
#   exact RelativeShift done in VMEM (f32), softmax (f32), P @ V.
# ----------------------------------------------------------------------------
def _attn_kernel(q_ref, k_ref, v_ref, rw_ref, rr_ref, r_ref, *out_refs,
                 seq_len, len_r, scale, with_probs):
    if with_probs:
        probs_ref, ctx_ref = out_refs
    else:
        (ctx_ref,) = out_refs

    T = seq_len
    R1 = len_r + 1

    q = q_ref[0, 0, 0]                      # (T, d)  bf16
    k = k_ref[0, 0, 0]                      # (T, d)  bf16
    v = v_ref[0, 0, 0]                      # (T, d)  bf16
    rw = rw_ref[0]                          # (1, d)  bf16
    rr = rr_ref[0]                          # (1, d)  bf16
    r = r_ref[0]                            # (R1, d) bf16, last row all-zero

    ac = scale * lax.dot_general(q + rw, k, (((1,), (1,)), ((), ())),
                                 preferred_element_type=jnp.float32)   # (T,T)
    bd = scale * lax.dot_general(q + rr, r, (((1,), (1,)), ((), ())),
                                 preferred_element_type=jnp.float32)   # (T,R1)

    # Exact RelativeShift, fused (f32, no HBM round-trip):
    #   out[t, j] == flat([bd | 0-col])[T - 1 + t*len_r + j]
    #             == row t of [bd[t] ; bd[t+1]] rotated LEFT by (T-1-t), lane j.
    # The row-varying rotation is realised as a barrel shifter of log2(T)
    # static rotations (static slice+concat; pltpu.roll(stride=...) would be
    # the XLU-native alternative).
    bd_next = jnp.concatenate([bd[1:, :], bd[-1:, :]], axis=0)   # row t -> t+1
    ext = jnp.concatenate([bd, bd_next], axis=1)                 # (T, 2*R1)
    width = 2 * R1
    row = lax.broadcasted_iota(jnp.int32, (T, width), 0)
    shift = (T - 1) - row                                        # per-row amount
    for kb in range((T - 1).bit_length()):
        amt = 1 << kb
        rolled = jnp.concatenate([ext[:, amt:], ext[:, :amt]], axis=1)
        bit = (shift >> kb) & 1
        ext = jnp.where(bit == 1, rolled, ext)
    scores = ac + ext[:, :T]                                     # (T, T) f32

    # f32 softmax; approx reciprocal -> rows sum to ~1 (not bit-exactly 1).
    m = jnp.max(scores, axis=-1, keepdims=True)
    e = jnp.exp(scores - m)
    p = e * pl.reciprocal(jnp.sum(e, axis=-1, keepdims=True), approx=True)

    if with_probs:
        probs_ref[0, 0] = p.astype(probs_ref.dtype)              # bf16 store

    ctx = lax.dot_general(p.astype(v.dtype), v, (((1,), (0,)), ((), ())),
                          preferred_element_type=jnp.float32)    # (T, d)
    ctx_ref[0, 0] = ctx.astype(ctx_ref.dtype)


# ----------------------------------------------------------------------------
# Forward wrapper
# ----------------------------------------------------------------------------
def relative_self_attn_forward(inp, pos, params, num_heads, *,
                               return_coverage=True):
    T, B, E = inp.shape
    len_r = pos.shape[0]
    h = num_heads
    d = E // h
    assert h * d == E
    assert len_r >= T, "relative positions must cover at least len_k == T"
    scale = float(d) ** (-0.5)

    # ---- one-time parameter re-layout (weight-sized only) -------------------
    # in_proj rows are stored (head, {q,k,v}, d); regroup to ({q,k,v}, head, d).
    w_r = params["in_w"].reshape(h, 3, d, E)
    b_r = params["in_b"].reshape(h, 3, d)
    w_qkv = jnp.stack([w_r[:, j].reshape(E, E).T for j in range(3)], axis=0)
    b_qkv = jnp.stack([b_r[:, j].reshape(1, E) for j in range(3)], axis=0)
    w_pos = params["pos_w"].T[None]
    b_pos = params["pos_b"].reshape(1, 1, E)
    w_out = params["out_w"].T[None]
    b_out = params["out_b"].reshape(1, 1, E)
    rw = params["r_w_bias"].reshape(h, 1, d).astype(jnp.bfloat16)
    rr = params["r_r_bias"].reshape(h, 1, d).astype(jnp.bfloat16)

    # ---- fused q/k/v projection -> head-major [3, B, h, T, d] ---------------
    x_bt = jnp.transpose(inp, (1, 0, 2)).reshape(B * T, E)
    qkv = linear_stacked(x_bt, w_qkv, b_qkv, jnp.bfloat16)          # [3,B*T,E]
    qkv = jnp.transpose(qkv.reshape(3, B, T, h, d), (0, 1, 3, 2, 4))  # head-major

    # ---- positional projection, head-major, plus one all-zero row -----------
    r_proj = linear_stacked(pos.reshape(len_r, E), w_pos, b_pos,
                            jnp.bfloat16)[0]                        # [len_r, E]
    r_hm = jnp.transpose(r_proj.reshape(len_r, h, d), (1, 0, 2))    # [h,len_r,d]
    r_ext = jnp.concatenate([r_hm, jnp.zeros((h, 1, d), jnp.bfloat16)], axis=1)
    R1 = len_r + 1

    # ---- fused attention: AC + BD + shift + softmax + P@V -------------------
    grid = (B, h)
    out_shapes = []
    out_specs = []
    if return_coverage:
        out_shapes.append(jax.ShapeDtypeStruct((B, h, T, T), jnp.bfloat16))
        out_specs.append(pl.BlockSpec((1, 1, T, T), lambda b, hh: (b, hh, 0, 0)))
    out_shapes.append(jax.ShapeDtypeStruct((B, h, T, d), jnp.bfloat16))
    out_specs.append(pl.BlockSpec((1, 1, T, d), lambda b, hh: (b, hh, 0, 0)))

    res = pl.pallas_call(
        functools.partial(_attn_kernel, seq_len=T, len_r=len_r, scale=scale,
                          with_probs=return_coverage),
        grid=grid,
        in_specs=[
            pl.BlockSpec((1, 1, 1, T, d), lambda b, hh: (0, b, hh, 0, 0)),  # q
            pl.BlockSpec((1, 1, 1, T, d), lambda b, hh: (1, b, hh, 0, 0)),  # k
            pl.BlockSpec((1, 1, 1, T, d), lambda b, hh: (2, b, hh, 0, 0)),  # v
            pl.BlockSpec((1, 1, d), lambda b, hh: (hh, 0, 0)),              # r_w_bias
            pl.BlockSpec((1, 1, d), lambda b, hh: (hh, 0, 0)),              # r_r_bias
            pl.BlockSpec((1, R1, d), lambda b, hh: (hh, 0, 0)),             # r_ext
        ],
        out_specs=out_specs,
        out_shape=out_shapes,
        compiler_params=pltpu.CompilerParams(
            dimension_semantics=("parallel", "parallel"),
            vmem_limit_bytes=_VMEM_LIMIT),
    )(qkv, qkv, qkv, rw, rr, r_ext)

    if return_coverage:
        probs, ctx = res
        coverage = probs.reshape(B * h, T, T)
    else:
        ctx = res[0]
        coverage = None

    # ---- output projection ---------------------------------------------------
    ctx_flat = jnp.transpose(ctx, (0, 2, 1, 3)).reshape(B * T, E)   # [B*T, E]
    out = linear_stacked(ctx_flat, w_out, b_out, jnp.float32)[0]
    out = jnp.transpose(out.reshape(B, T, E), (1, 0, 2))            # [T, B, E]
    return out, coverage


# ----------------------------------------------------------------------------
# Pure-JAX reference (mirrors the PyTorch autograd path, eval / no mask)
# ----------------------------------------------------------------------------
def relative_shift(x):
    """Mirror of onmt RelativeShift.forward(x, batch_first=True, emb_last=False)."""
    bsz, len_q, len_r = x.shape
    zero_pad = jnp.zeros((bsz, len_q, 1), dtype=x.dtype)
    x_padded = jnp.concatenate([zero_pad, x], axis=2)
    x_padded = x_padded.reshape(bsz, len_r + 1, len_q)
    return x_padded[:, 1:, :].reshape(bsz, len_q, len_r)


def reference_forward(inp, pos, params, num_heads):
    T, B, E = inp.shape
    h = num_heads
    d = E // h
    scale = float(d) ** (-0.5)

    lin = jnp.dot(inp.reshape(T * B, E), params["in_w"].T,
                  precision=HIGHEST) + params["in_b"]
    lin = lin.reshape(T, B, h, 3, d)
    q, k, v = lin[..., 0, :], lin[..., 1, :], lin[..., 2, :]

    pos_lin = jnp.dot(pos.reshape(-1, E), params["pos_w"].T,
                      precision=HIGHEST) + params["pos_b"]
    r_head_k = pos_lin.reshape(pos.shape[0], h, d)

    rw_q = q + params["r_w_bias"][None, None]
    rr_q = q + params["r_r_bias"][None, None]
    ac = scale * jnp.einsum("tbhd,sbhd->bhts", rw_q, k, precision=HIGHEST)
    bd = scale * jnp.einsum("tbhd,rhd->bhtr", rr_q, r_head_k, precision=HIGHEST)
    bd = relative_shift(bd.reshape(B * h, T, -1))[:, :, :T].reshape(B, h, T, T)
    probs = jax.nn.softmax(ac + bd, axis=-1)
    ctx = jnp.einsum("bhts,sbhd->tbhd", probs, v, precision=HIGHEST)
    out = jnp.dot(ctx.reshape(T * B, E), params["out_w"].T,
                  precision=HIGHEST) + params["out_b"]
    return out.reshape(T, B, E), probs.reshape(B * h, T, T)


# ----------------------------------------------------------------------------
# Main
# ----------------------------------------------------------------------------
if __name__ == "__main__":
    T, B, E, H = 16, 2, 128, 4          # seq, batch, embed_dim, num_heads
    d = E // H

    key = jax.random.PRNGKey(0)
    ks = jax.random.split(key, 8)
    std = (2.0 / (E + E)) ** 0.5        # matches reset_parameters('normal')

    params = {
        "in_w": std * jax.random.normal(ks[0], (3 * E, E), jnp.float32),
        "out_w": std * jax.random.normal(ks[1], (E, E), jnp.float32),
        "pos_w": std * jax.random.normal(ks[2], (E, E), jnp.float32),
        "in_b": jnp.zeros((3 * E,), jnp.float32),
        "out_b": jnp.zeros((E,), jnp.float32),
        "pos_b": jnp.zeros((E,), jnp.float32),
        "r_w_bias": 0.02 * jax.random.normal(ks[3], (H, d), jnp.float32),
        "r_r_bias": 0.02 * jax.random.normal(ks[4], (H, d), jnp.float32),
    }

    inp = jax.random.normal(ks[5], (T, B, E), jnp.float32)   # [T x B x H]
    pos = jax.random.normal(ks[6], (T, 1, E), jnp.float32)   # [T x 1 x H]

    fwd = jax.jit(relative_self_attn_forward, static_argnums=(3,))
    out, coverage = fwd(inp, pos, params, H)
    out = jax.block_until_ready(out)
    coverage = jax.block_until_ready(coverage)

    ref_out, ref_cov = reference_forward(inp, pos, params, H)
    # bf16 matmul operands / bf16 coverage storage (f32 accumulation & softmax)
    # vs. an all-f32 HIGHEST reference -> relaxed tolerances.
    np.testing.assert_allclose(np.asarray(coverage).astype(np.float32),
                               np.asarray(ref_cov),
                               rtol=5e-2, atol=5e-2)
    np.testing.assert_allclose(np.asarray(out), np.asarray(ref_out),
                               rtol=5e-2, atol=1e-1)

    print("KERNEL_OK")
</pallas_src>

<mosaic_0001>
module attributes {stable_mosaic.version = 11 : i64} {
  func.func @_linear_kernel(%arg0: i32, %arg1: i32, %arg2: i32, %arg3: i32, %arg4: memref<32x128xbf16, #tpu.memory_space<vmem>>, %arg5: memref<1x128x128xbf16, #tpu.memory_space<vmem>>, %arg6: memref<1x1x128xf32, #tpu.memory_space<vmem>>, %arg7: memref<1x32x128xbf16, #tpu.memory_space<vmem>>, %arg8: memref<32x128xf32, #tpu.memory_space<vmem>>) attributes {dimension_semantics = [#tpu.dimension_semantics<parallel>, #tpu.dimension_semantics<parallel>, #tpu.dimension_semantics<parallel>, #tpu.dimension_semantics<arbitrary>], iteration_bounds = array<i64: 3, 1, 1, 1>, scalar_prefetch = 0 : i64, scratch_operands = 1 : i64, tpu.core_type = #tpu.core_type<tc>, window_params = [{transform_indices = @transform_0, window_bounds = array<i64: 32, 128>}, {transform_indices = @transform_1, window_bounds = array<i64: 1, 128, 128>}, {transform_indices = @transform_2, window_bounds = array<i64: 1, 1, 128>}, {transform_indices = @transform_3, window_bounds = array<i64: 1, 32, 128>}]} {
    %c0_i32 = arith.constant 0 : i32
    %0 = arith.cmpi eq, %arg3, %c0_i32 : i32
    %1 = arith.extui %0 : i1 to i32
    %c0_i32_0 = arith.constant 0 : i32
    %2 = arith.cmpi ne, %1, %c0_i32_0 : i32
    scf.if %2 {
      %cst_11 = arith.constant 0.000000e+00 : f32
      %13 = vector.broadcast %cst_11 : f32 to vector<32x128xf32>
      %c0_12 = arith.constant 0 : index
      %c0_13 = arith.constant 0 : index
      %14 = vector.load %arg8[%c0_12, %c0_13] : memref<32x128xf32, #tpu.memory_space<vmem>>, vector<32x128xf32>
      tpu.vector_store %arg8[%c0_12, %c0_13], %13 {strides = array<i32>} : memref<32x128xf32, #tpu.memory_space<vmem>>, vector<32x128xf32>,
    } else {
    }
    %c0 = arith.constant 0 : index
    %c0_1 = arith.constant 0 : index
    %3 = vector.load %arg8[%c0, %c0_1] : memref<32x128xf32, #tpu.memory_space<vmem>>, vector<32x128xf32>
    %c0_2 = arith.constant 0 : index
    %c0_3 = arith.constant 0 : index
    %4 = vector.load %arg4[%c0_2, %c0_3] : memref<32x128xbf16, #tpu.memory_space<vmem>>, vector<32x128xbf16>
    %c0_4 = arith.constant 0 : index
    %c0_5 = arith.constant 0 : index
    %c0_6 = arith.constant 0 : index
    %5 = vector.load %arg5[%c0_4, %c0_5, %c0_6] : memref<1x128x128xbf16, #tpu.memory_space<vmem>>, vector<1x128x128xbf16>
    %6 = vector.shape_cast %5 : vector<1x128x128xbf16> to vector<128x128xbf16>
    %cst = arith.constant dense<0.000000e+00> : vector<32x128xf32>
    %7 = tpu.matmul %4, %6, %cst {dimension_numbers = #tpu.dot_dimension_numbers<[1], [0], [0], [1], [0, 0, 1, 1], [], []>} : vector<32x128xbf16>, vector<128x128xbf16>, vector<32x128xf32> -> vector<32x128xf32>
    %8 = arith.addf %3, %7 : vector<32x128xf32>
    %c0_7 = arith.constant 0 : index
    %c0_8 = arith.constant 0 : index
    %9 = vector.load %arg8[%c0_7, %c0_8] : memref<32x128xf32, #tpu.memory_space<vmem>>, vector<32x128xf32>
    tpu.vector_store %arg8[%c0_7, %c0_8], %8 {strides = array<i32>} : memref<32x128xf32, #tpu.memory_space<vmem>>, vector<32x128xf32>,
    %c0_i32_9 = arith.constant 0 : i32
    %10 = arith.cmpi eq, %arg3, %c0_i32_9 : i32
    %11 = arith.extui %10 : i1 to i32
    %c0_i32_10 = arith.constant 0 : i32
    %12 = arith.cmpi ne, %11, %c0_i32_10 : i32
    scf.if %12 {
      %c0_11 = arith.constant 0 : index
      %c0_12 = arith.constant 0 : index
      %13 = vector.load %arg8[%c0_11, %c0_12] : memref<32x128xf32, #tpu.memory_space<vmem>>, vector<32x128xf32>
      %c0_13 = arith.constant 0 : index
      %c0_14 = arith.constant 0 : index
      %c0_15 = arith.constant 0 : index
      %14 = vector.load %arg6[%c0_13, %c0_14, %c0_15] : memref<1x1x128xf32, #tpu.memory_space<vmem>>, vector<1x1x128xf32>
      %15 = vector.shape_cast %14 : vector<1x1x128xf32> to vector<1x128xf32>
      %16 = vector.broadcast %15 : vector<1x128xf32> to vector<32x128xf32>
      %17 = arith.addf %13, %16 : vector<32x128xf32>
      %18 = arith.truncf %17 : vector<32x128xf32> to vector<32x128xbf16>
      %c0_16 = arith.constant 0 : index
      %c0_17 = arith.constant 0 : index
      %c0_18 = arith.constant 0 : index
      %19 = vector.load %arg7[%c0_16, %c0_17, %c0_18] : memref<1x32x128xbf16, #tpu.memory_space<vmem>>, vector<1x32x128xbf16>
      %20 = vector.shape_cast %19 : vector<1x32x128xbf16> to vector<32x128xbf16>
      %21 = vector.shape_cast %18 : vector<32x128xbf16> to vector<1x32x128xbf16>
      tpu.vector_store %arg7[%c0_16, %c0_17, %c0_18], %21 {strides = array<i32>} : memref<1x32x128xbf16, #tpu.memory_space<vmem>>, vector<1x32x128xbf16>,
    } else {
    }
    return
  }
  func.func @transform_0(%arg0: i32, %arg1: i32, %arg2: i32, %arg3: i32) -> (i32, i32) {
    %c0_i32 = arith.constant 0 : i32
    return %arg1, %arg3 : i32, i32
  }
  func.func @transform_1(%arg0: i32, %arg1: i32, %arg2: i32, %arg3: i32) -> (i32, i32, i32) {
    %c0_i32 = arith.constant 0 : i32
    return %arg0, %arg3, %arg2 : i32, i32, i32
  }
  func.func @transform_2(%arg0: i32, %arg1: i32, %arg2: i32, %arg3: i32) -> (i32, i32, i32) {
    %c0_i32 = arith.constant 0 : i32
    %c0_i32_0 = arith.constant 0 : i32
    return %arg0, %c0_i32, %arg2 : i32, i32, i32
  }
  func.func @transform_3(%arg0: i32, %arg1: i32, %arg2: i32, %arg3: i32) -> (i32, i32, i32) {
    %c0_i32 = arith.constant 0 : i32
    return %arg0, %arg1, %arg2 : i32, i32, i32
  }
}

module attributes {stable_mosaic.version = 11 : i64} {
  func.func @_linear_kernel(%arg0: i32, %arg1: i32, %arg2: i32, %arg3: i32, %arg4: memref<16x128xbf16, #tpu.memory_space<vmem>>, %arg5: memref<1x128x128xbf16, #tpu.memory_space<vmem>>, %arg6: memref<1x1x128xf32, #tpu.memory_space<vmem>>, %arg7: memref<1x16x128xbf16, #tpu.memory_space<vmem>>, %arg8: memref<16x128xf32, #tpu.memory_space<vmem>>) attributes {dimension_semantics = [#tpu.dimension_semantics<parallel>, #tpu.dimension_semantics<parallel>, #tpu.dimension_semantics<parallel>, #tpu.dimension_semantics<arbitrary>], iteration_bounds = array<i64: 1, 1, 1, 1>, scalar_prefetch = 0 : i64, scratch_operands = 1 : i64, tpu.core_type = #tpu.core_type<tc>, window_params = [{transform_indices = @transform_0, window_bounds = array<i64: 16, 128>}, {transform_indices = @transform_1, window_bounds = array<i64: 1, 128, 128>}, {transform_indices = @transform_2, window_bounds = array<i64: 1, 1, 128>}, {transform_indices = @transform_3, window_bounds = array<i64: 1, 16, 128>}]} {
    %c0_i32 = arith.constant 0 : i32
    %0 = arith.cmpi eq, %arg3, %c0_i32 : i32
    %1 = arith.extui %0 : i1 to i32
    %c0_i32_0 = arith.constant 0 : i32
    %2 = arith.cmpi ne, %1, %c0_i32_0 : i32
    scf.if %2 {
      %cst_11 = arith.constant 0.000000e+00 : f32
      %13 = vector.broadcast %cst_11 : f32 to vector<16x128xf32>
      %c0_12 = arith.constant 0 : index
      %c0_13 = arith.constant 0 : index
      %14 = vector.load %arg8[%c0_12, %c0_13] : memref<16x128xf32, #tpu.memory_space<vmem>>, vector<16x128xf32>
      tpu.vector_store %arg8[%c0_12, %c0_13], %13 {strides = array<i32>} : memref<16x128xf32, #tpu.memory_space<vmem>>, vector<16x128xf32>,
    } else {
    }
    %c0 = arith.constant 0 : index
    %c0_1 = arith.constant 0 : index
    %3 = vector.load %arg8[%c0, %c0_1] : memref<16x128xf32, #tpu.memory_space<vmem>>, vector<16x128xf32>
    %c0_2 = arith.constant 0 : index
    %c0_3 = arith.constant 0 : index
    %4 = vector.load %arg4[%c0_2, %c0_3] : memref<16x128xbf16, #tpu.memory_space<vmem>>, vector<16x128xbf16>
    %c0_4 = arith.constant 0 : index
    %c0_5 = arith.constant 0 : index
    %c0_6 = arith.constant 0 : index
    %5 = vector.load %arg5[%c0_4, %c0_5, %c0_6] : memref<1x128x128xbf16, #tpu.memory_space<vmem>>, vector<1x128x128xbf16>
    %6 = vector.shape_cast %5 : vector<1x128x128xbf16> to vector<128x128xbf16>
    %cst = arith.constant dense<0.000000e+00> : vector<16x128xf32>
    %7 = tpu.matmul %4, %6, %cst {dimension_numbers = #tpu.dot_dimension_numbers<[1], [0], [0], [1], [0, 0, 1, 1], [], []>} : vector<16x128xbf16>, vector<128x128xbf16>, vector<16x128xf32> -> vector<16x128xf32>
    %8 = arith.addf %3, %7 : vector<16x128xf32>
    %c0_7 = arith.constant 0 : index
    %c0_8 = arith.constant 0 : index
    %9 = vector.load %arg8[%c0_7, %c0_8] : memref<16x128xf32, #tpu.memory_space<vmem>>, vector<16x128xf32>
    tpu.vector_store %arg8[%c0_7, %c0_8], %8 {strides = array<i32>} : memref<16x128xf32, #tpu.memory_space<vmem>>, vector<16x128xf32>,
    %c0_i32_9 = arith.constant 0 : i32
    %10 = arith.cmpi eq, %arg3, %c0_i32_9 : i32
    %11 = arith.extui %10 : i1 to i32
    %c0_i32_10 = arith.constant 0 : i32
    %12 = arith.cmpi ne, %11, %c0_i32_10 : i32
    scf.if %12 {
      %c0_11 = arith.constant 0 : index
      %c0_12 = arith.constant 0 : index
      %13 = vector.load %arg8[%c0_11, %c0_12] : memref<16x128xf32, #tpu.memory_space<vmem>>, vector<16x128xf32>
      %c0_13 = arith.constant 0 : index
      %c0_14 = arith.constant 0 : index
      %c0_15 = arith.constant 0 : index
      %14 = vector.load %arg6[%c0_13, %c0_14, %c0_15] : memref<1x1x128xf32, #tpu.memory_space<vmem>>, vector<1x1x128xf32>
      %15 = vector.shape_cast %14 : vector<1x1x128xf32> to vector<1x128xf32>
      %16 = vector.broadcast %15 : vector<1x128xf32> to vector<16x128xf32>
      %17 = arith.addf %13, %16 : vector<16x128xf32>
      %18 = arith.truncf %17 : vector<16x128xf32> to vector<16x128xbf16>
      %c0_16 = arith.constant 0 : index
      %c0_17 = arith.constant 0 : index
      %c0_18 = arith.constant 0 : index
      %19 = vector.load %arg7[%c0_16, %c0_17, %c0_18] : memref<1x16x128xbf16, #tpu.memory_space<vmem>>, vector<1x16x128xbf16>
      %20 = vector.shape_cast %19 : vector<1x16x128xbf16> to vector<16x128xbf16>
      %21 = vector.shape_cast %18 : vector<16x128xbf16> to vector<1x16x128xbf16>
      tpu.vector_store %arg7[%c0_16, %c0_17, %c0_18], %21 {strides = array<i32>} : memref<1x16x128xbf16, #tpu.memory_space<vmem>>, vector<1x16x128xbf16>,
    } else {
    }
    return
  }
  func.func @transform_0(%arg0: i32, %arg1: i32, %arg2: i32, %arg3: i32) -> (i32, i32) {
    %c0_i32 = arith.constant 0 : i32
    return %arg1, %arg3 : i32, i32
  }
  func.func @transform_1(%arg0: i32, %arg1: i32, %arg2: i32, %arg3: i32) -> (i32, i32, i32) {
    %c0_i32 = arith.constant 0 : i32
    return %arg0, %arg3, %arg2 : i32, i32, i32
  }
  func.func @transform_2(%arg0: i32, %arg1: i32, %arg2: i32, %arg3: i32) -> (i32, i32, i32) {
    %c0_i32 = arith.constant 0 : i32
    %c0_i32_0 = arith.constant 0 : i32
    return %arg0, %c0_i32, %arg2 : i32, i32, i32
  }
  func.func @transform_3(%arg0: i32, %arg1: i32, %arg2: i32, %arg3: i32) -> (i32, i32, i32) {
    %c0_i32 = arith.constant 0 : i32
    return %arg0, %arg1, %arg2 : i32, i32, i32
  }
}

module attributes {stable_mosaic.version = 11 : i64} {
  func.func @_attn_kernel(%arg0: i32, %arg1: i32, %arg2: memref<1x1x1x16x32xbf16, #tpu.memory_space<vmem>>, %arg3: memref<1x1x1x16x32xbf16, #tpu.memory_space<vmem>>, %arg4: memref<1x1x1x16x32xbf16, #tpu.memory_space<vmem>>, %arg5: memref<1x1x32xbf16, #tpu.memory_space<vmem>>, %arg6: memref<1x1x32xbf16, #tpu.memory_space<vmem>>, %arg7: memref<1x17x32xbf16, #tpu.memory_space<vmem>>, %arg8: memref<1x1x16x16xbf16, #tpu.memory_space<vmem>>, %arg9: memref<1x1x16x32xbf16, #tpu.memory_space<vmem>>) attributes {dimension_semantics = [#tpu.dimension_semantics<parallel>, #tpu.dimension_semantics<parallel>], iteration_bounds = array<i64: 2, 4>, scalar_prefetch = 0 : i64, scratch_operands = 0 : i64, tpu.core_type = #tpu.core_type<tc>, window_params = [{transform_indices = @transform_0, window_bounds = array<i64: 1, 1, 1, 16, 32>}, {transform_indices = @transform_1, window_bounds = array<i64: 1, 1, 1, 16, 32>}, {transform_indices = @transform_2, window_bounds = array<i64: 1, 1, 1, 16, 32>}, {transform_indices = @transform_3, window_bounds = array<i64: 1, 1, 32>}, {transform_indices = @transform_4, window_bounds = array<i64: 1, 1, 32>}, {transform_indices = @transform_5, window_bounds = array<i64: 1, 17, 32>}, {transform_indices = @transform_6, window_bounds = array<i64: 1, 1, 16, 16>}, {transform_indices = @transform_7, window_bounds = array<i64: 1, 1, 16, 32>}]} {
    %c0 = arith.constant 0 : index
    %c0_0 = arith.constant 0 : index
    %c0_1 = arith.constant 0 : index
    %c0_2 = arith.constant 0 : index
    %c0_3 = arith.constant 0 : index
    %0 = vector.load %arg2[%c0, %c0_0, %c0_1, %c0_2, %c0_3] : memref<1x1x1x16x32xbf16, #tpu.memory_space<vmem>>, vector<1x1x1x16x32xbf16>
    %1 = vector.shape_cast %0 : vector<1x1x1x16x32xbf16> to vector<16x32xbf16>
    %c0_4 = arith.constant 0 : index
    %c0_5 = arith.constant 0 : index
    %c0_6 = arith.constant 0 : index
    %c0_7 = arith.constant 0 : index
    %c0_8 = arith.constant 0 : index
    %2 = vector.load %arg3[%c0_4, %c0_5, %c0_6, %c0_7, %c0_8] : memref<1x1x1x16x32xbf16, #tpu.memory_space<vmem>>, vector<1x1x1x16x32xbf16>
    %3 = vector.shape_cast %2 : vector<1x1x1x16x32xbf16> to vector<16x32xbf16>
    %c0_9 = arith.constant 0 : index
    %c0_10 = arith.constant 0 : index
    %c0_11 = arith.constant 0 : index
    %c0_12 = arith.constant 0 : index
    %c0_13 = arith.constant 0 : index
    %4 = vector.load %arg4[%c0_9, %c0_10, %c0_11, %c0_12, %c0_13] : memref<1x1x1x16x32xbf16, #tpu.memory_space<vmem>>, vector<1x1x1x16x32xbf16>
    %5 = vector.shape_cast %4 : vector<1x1x1x16x32xbf16> to vector<16x32xbf16>
    %c0_14 = arith.constant 0 : index
    %c0_15 = arith.constant 0 : index
    %c0_16 = arith.constant 0 : index
    %6 = vector.load %arg5[%c0_14, %c0_15, %c0_16] : memref<1x1x32xbf16, #tpu.memory_space<vmem>>, vector<1x1x32xbf16>
    %7 = vector.shape_cast %6 : vector<1x1x32xbf16> to vector<1x32xbf16>
    %c0_17 = arith.constant 0 : index
    %c0_18 = arith.constant 0 : index
    %c0_19 = arith.constant 0 : index
    %8 = vector.load %arg6[%c0_17, %c0_18, %c0_19] : memref<1x1x32xbf16, #tpu.memory_space<vmem>>, vector<1x1x32xbf16>
    %9 = vector.shape_cast %8 : vector<1x1x32xbf16> to vector<1x32xbf16>
    %c0_20 = arith.constant 0 : index
    %c0_21 = arith.constant 0 : index
    %c0_22 = arith.constant 0 : index
    %10 = vector.load %arg7[%c0_20, %c0_21, %c0_22] : memref<1x17x32xbf16, #tpu.memory_space<vmem>>, vector<1x17x32xbf16>
    %11 = vector.shape_cast %10 : vector<1x17x32xbf16> to vector<17x32xbf16>
    %12 = vector.broadcast %7 : vector<1x32xbf16> to vector<16x32xbf16>
    %13 = arith.addf %1, %12 : vector<16x32xbf16>
    %cst = arith.constant dense<0.000000e+00> : vector<16x16xf32>
    %14 = tpu.matmul %13, %3, %cst {dimension_numbers = #tpu.dot_dimension_numbers<[1], [1], [0], [0], [0, 0, 1, 0], [], []>} : vector<16x32xbf16>, vector<16x32xbf16>, vector<16x16xf32> -> vector<16x16xf32>
    %cst_23 = arith.constant 0.176776692 : f32
    %15 = vector.broadcast %cst_23 : f32 to vector<16x16xf32>
    %16 = arith.mulf %15, %14 : vector<16x16xf32>
    %17 = vector.broadcast %9 : vector<1x32xbf16> to vector<16x32xbf16>
    %18 = arith.addf %1, %17 : vector<16x32xbf16>
    %cst_24 = arith.constant dense<0.000000e+00> : vector<16x17xf32>
    %19 = tpu.matmul %18, %11, %cst_24 {dimension_numbers = #tpu.dot_dimension_numbers<[1], [1], [0], [0], [0, 0, 1, 0], [], []>} : vector<16x32xbf16>, vector<17x32xbf16>, vector<16x17xf32> -> vector<16x17xf32>
    %cst_25 = arith.constant 0.176776692 : f32
    %20 = vector.broadcast %cst_25 : f32 to vector<16x17xf32>
    %21 = arith.mulf %20, %19 : vector<16x17xf32>
    %22 = vector.extract_strided_slice %21 {offsets = [1, 0], sizes = [15, 17], strides = [1, 1]} : vector<16x17xf32> to vector<15x17xf32>
    %23 = vector.extract_strided_slice %21 {offsets = [15, 0], sizes = [1, 17], strides = [1, 1]} : vector<16x17xf32> to vector<1x17xf32>
    %24 = tpu.concatenate %22, %23 in 0 : vector<15x17xf32>, vector<1x17xf32> -> vector<16x17xf32>
    %25 = tpu.concatenate %21, %24 in 1 : vector<16x17xf32>, vector<16x17xf32> -> vector<16x34xf32>
    %26 = tpu.iota {dimensions = array<i32: 0>} : vector<16x34xi32>
    %c15_i32 = arith.constant 15 : i32
    %27 = vector.broadcast %c15_i32 : i32 to vector<16x34xi32>
    %28 = arith.subi %27, %26 : vector<16x34xi32>
    %29 = vector.extract_strided_slice %25 {offsets = [0, 1], sizes = [16, 33], strides = [1, 1]} : vector<16x34xf32> to vector<16x33xf32>
    %30 = vector.extract_strided_slice %25 {offsets = [0, 0], sizes = [16, 1], strides = [1, 1]} : vector<16x34xf32> to vector<16x1xf32>
    %31 = tpu.concatenate %29, %30 in 1 : vector<16x33xf32>, vector<16x1xf32> -> vector<16x34xf32>
    %c0_i32 = arith.constant 0 : i32
    %32 = vector.broadcast %c0_i32 : i32 to vector<16x34xi32>
    %33 = arith.shrsi %28, %32 : vector<16x34xi32>
    %c1_i32 = arith.constant 1 : i32
    %34 = vector.broadcast %c1_i32 : i32 to vector<16x34xi32>
    %35 = arith.andi %33, %34 : vector<16x34xi32>
    %c1_i32_26 = arith.constant 1 : i32
    %36 = vector.broadcast %c1_i32_26 : i32 to vector<16x34xi32>
    %37 = arith.cmpi eq, %35, %36 : vector<16x34xi32>
    %38 = arith.select %37, %31, %25 : vector<16x34xi1>, vector<16x34xf32>
    %39 = vector.extract_strided_slice %38 {offsets = [0, 2], sizes = [16, 32], strides = [1, 1]} : vector<16x34xf32> to vector<16x32xf32>
    %40 = vector.extract_strided_slice %38 {offsets = [0, 0], sizes = [16, 2], strides = [1, 1]} : vector<16x34xf32> to vector<16x2xf32>
    %41 = tpu.concatenate %39, %40 in 1 : vector<16x32xf32>, vector<16x2xf32> -> vector<16x34xf32>
    %c1_i32_27 = arith.constant 1 : i32
    %42 = vector.broadcast %c1_i32_27 : i32 to vector<16x34xi32>
    %43 = arith.shrsi %28, %42 : vector<16x34xi32>
    %c1_i32_28 = arith.constant 1 : i32
    %44 = vector.broadcast %c1_i32_28 : i32 to vector<16x34xi32>
    %45 = arith.andi %43, %44 : vector<16x34xi32>
    %c1_i32_29 = arith.constant 1 : i32
    %46 = vector.broadcast %c1_i32_29 : i32 to vector<16x34xi32>
    %47 = arith.cmpi eq, %45, %46 : vector<16x34xi32>
    %48 = arith.select %47, %41, %38 : vector<16x34xi1>, vector<16x34xf32>
    %49 = vector.extract_strided_slice %48 {offsets = [0, 4], sizes = [16, 30], strides = [1, 1]} : vector<16x34xf32> to vector<16x30xf32>
    %50 = vector.extract_strided_slice %48 {offsets = [0, 0], sizes = [16, 4], strides = [1, 1]} : vector<16x34xf32> to vector<16x4xf32>
    %51 = tpu.concatenate %49, %50 in 1 : vector<16x30xf32>, vector<16x4xf32> -> vector<16x34xf32>
    %c2_i32 = arith.constant 2 : i32
    %52 = vector.broadcast %c2_i32 : i32 to vector<16x34xi32>
    %53 = arith.shrsi %28, %52 : vector<16x34xi32>
    %c1_i32_30 = arith.constant 1 : i32
    %54 = vector.broadcast %c1_i32_30 : i32 to vector<16x34xi32>
    %55 = arith.andi %53, %54 : vector<16x34xi32>
    %c1_i32_31 = arith.constant 1 : i32
    %56 = vector.broadcast %c1_i32_31 : i32 to vector<16x34xi32>
    %57 = arith.cmpi eq, %55, %56 : vector<16x34xi32>
    %58 = arith.select %57, %51, %48 : vector<16x34xi1>, vector<16x34xf32>
    %59 = vector.extract_strided_slice %58 {offsets = [0, 8], sizes = [16, 26], strides = [1, 1]} : vector<16x34xf32> to vector<16x26xf32>
    %60 = vector.extract_strided_slice %58 {offsets = [0, 0], sizes = [16, 8], strides = [1, 1]} : vector<16x34xf32> to vector<16x8xf32>
    %61 = tpu.concatenate %59, %60 in 1 : vector<16x26xf32>, vector<16x8xf32> -> vector<16x34xf32>
    %c3_i32 = arith.constant 3 : i32
    %62 = vector.broadcast %c3_i32 : i32 to vector<16x34xi32>
    %63 = arith.shrsi %28, %62 : vector<16x34xi32>
    %c1_i32_32 = arith.constant 1 : i32
    %64 = vector.broadcast %c1_i32_32 : i32 to vector<16x34xi32>
    %65 = arith.andi %63, %64 : vector<16x34xi32>
    %c1_i32_33 = arith.constant 1 : i32
    %66 = vector.broadcast %c1_i32_33 : i32 to vector<16x34xi32>
    %67 = arith.cmpi eq, %65, %66 : vector<16x34xi32>
    %68 = arith.select %67, %61, %58 : vector<16x34xi1>, vector<16x34xf32>
    %69 = vector.extract_strided_slice %68 {offsets = [0, 0], sizes = [16, 16], strides = [1, 1]} : vector<16x34xf32> to vector<16x16xf32>
    %70 = arith.addf %16, %69 : vector<16x16xf32>
    %cst_34 = arith.constant dense<0xFF800000> : vector<16xf32>
    %71 = vector.multi_reduction <maximumf>, %70, %cst_34 [1] : vector<16x16xf32> to vector<16xf32>
    %72 = vector.shape_cast %71 : vector<16xf32> to vector<16x1xf32>
    %73 = vector.broadcast %72 : vector<16x1xf32> to vector<16x16xf32>
    %74 = arith.subf %70, %73 : vector<16x16xf32>
    %75 = math.exp %74 : vector<16x16xf32>
    %cst_35 = arith.constant dense<0.000000e+00> : vector<16xf32>
    %76 = vector.multi_reduction <add>, %75, %cst_35 [1] : vector<16x16xf32> to vector<16xf32>
    %77 = vector.shape_cast %76 : vector<16xf32> to vector<16x1xf32>
    %78 = tpu.reciprocal %77 {approx = true} : vector<16x1xf32> -> vector<16x1xf32>
    %79 = vector.broadcast %78 : vector<16x1xf32> to vector<16x16xf32>
    %80 = arith.mulf %75, %79 : vector<16x16xf32>
    %81 = arith.truncf %80 : vector<16x16xf32> to vector<16x16xbf16>
    %c0_36 = arith.constant 0 : index
    %c0_37 = arith.constant 0 : index
    %c0_38 = arith.constant 0 : index
    %c0_39 = arith.constant 0 : index
    %82 = vector.load %arg8[%c0_36, %c0_37, %c0_38, %c0_39] : memref<1x1x16x16xbf16, #tpu.memory_space<vmem>>, vector<1x1x16x16xbf16>
    %83 = vector.shape_cast %82 : vector<1x1x16x16xbf16> to vector<16x16xbf16>
    %84 = vector.shape_cast %81 : vector<16x16xbf16> to vector<1x1x16x16xbf16>
    tpu.vector_store %arg8[%c0_36, %c0_37, %c0_38, %c0_39], %84 {strides = array<i32>} : memref<1x1x16x16xbf16, #tpu.memory_space<vmem>>, vector<1x1x16x16xbf16>,
    %85 = arith.truncf %80 : vector<16x16xf32> to vector<16x16xbf16>
    %cst_40 = arith.constant dense<0.000000e+00> : vector<16x32xf32>
    %86 = tpu.matmul %85, %5, %cst_40 {dimension_numbers = #tpu.dot_dimension_numbers<[1], [0], [0], [1], [0, 0, 1, 1], [], []>} : vector<16x16xbf16>, vector<16x32xbf16>, vector<16x32xf32> -> vector<16x32xf32>
    %87 = arith.truncf %86 : vector<16x32xf32> to vector<16x32xbf16>
    %c0_41 = arith.constant 0 : index
    %c0_42 = arith.constant 0 : index
    %c0_43 = arith.constant 0 : index
    %c0_44 = arith.constant 0 : index
    %88 = vector.load %arg9[%c0_41, %c0_42, %c0_43, %c0_44] : memref<1x1x16x32xbf16, #tpu.memory_space<vmem>>, vector<1x1x16x32xbf16>
    %89 = vector.shape_cast %88 : vector<1x1x16x32xbf16> to vector<16x32xbf16>
    %90 = vector.shape_cast %87 : vector<16x32xbf16> to vector<1x1x16x32xbf16>
    tpu.vector_store %arg9[%c0_41, %c0_42, %c0_43, %c0_44], %90 {strides = array<i32>} : memref<1x1x16x32xbf16, #tpu.memory_space<vmem>>, vector<1x1x16x32xbf16>,
    return
  }
  func.func @transform_0(%arg0: i32, %arg1: i32) -> (i32, i32, i32, i32, i32) {
    %c0_i32 = arith.constant 0 : i32
    %c0_i32_0 = arith.constant 0 : i32
    %c0_i32_1 = arith.constant 0 : i32
    %c0_i32_2 = arith.constant 0 : i32
    return %c0_i32, %arg0, %arg1, %c0_i32_0, %c0_i32_1 : i32, i32, i32, i32, i32
  }
  func.func @transform_1(%arg0: i32, %arg1: i32) -> (i32, i32, i32, i32, i32) {
    %c1_i32 = arith.constant 1 : i32
    %c0_i32 = arith.constant 0 : i32
    %c0_i32_0 = arith.constant 0 : i32
    %c0_i32_1 = arith.constant 0 : i32
    return %c1_i32, %arg0, %arg1, %c0_i32, %c0_i32_0 : i32, i32, i32, i32, i32
  }
  func.func @transform_2(%arg0: i32, %arg1: i32) -> (i32, i32, i32, i32, i32) {
    %c2_i32 = arith.constant 2 : i32
    %c0_i32 = arith.constant 0 : i32
    %c0_i32_0 = arith.constant 0 : i32
    %c0_i32_1 = arith.constant 0 : i32
    return %c2_i32, %arg0, %arg1, %c0_i32, %c0_i32_0 : i32, i32, i32, i32, i32
  }
  func.func @transform_3(%arg0: i32, %arg1: i32) -> (i32, i32, i32) {
    %c0_i32 = arith.constant 0 : i32
    %c0_i32_0 = arith.constant 0 : i32
    %c0_i32_1 = arith.constant 0 : i32
    return %arg1, %c0_i32, %c0_i32_0 : i32, i32, i32
  }
  func.func @transform_4(%arg0: i32, %arg1: i32) -> (i32, i32, i32) {
    %c0_i32 = arith.constant 0 : i32
    %c0_i32_0 = arith.constant 0 : i32
    %c0_i32_1 = arith.constant 0 : i32
    return %arg1, %c0_i32, %c0_i32_0 : i32, i32, i32
  }
  func.func @transform_5(%arg0: i32, %arg1: i32) -> (i32, i32, i32) {
    %c0_i32 = arith.constant 0 : i32
    %c0_i32_0 = arith.constant 0 : i32
    %c0_i32_1 = arith.constant 0 : i32
    return %arg1, %c0_i32, %c0_i32_0 : i32, i32, i32
  }
  func.func @transform_6(%arg0: i32, %arg1: i32) -> (i32, i32, i32, i32) {
    %c0_i32 = arith.constant 0 : i32
    %c0_i32_0 = arith.constant 0 : i32
    %c0_i32_1 = arith.constant 0 : i32
    return %arg0, %arg1, %c0_i32, %c0_i32_0 : i32, i32, i32, i32
  }
  func.func @transform_7(%arg0: i32, %arg1: i32) -> (i32, i32, i32, i32) {
    %c0_i32 = arith.constant 0 : i32
    %c0_i32_0 = arith.constant 0 : i32
    %c0_i32_1 = arith.constant 0 : i32
    return %arg0, %arg1, %c0_i32, %c0_i32_0 : i32, i32, i32, i32
  }
}

module attributes {stable_mosaic.version = 11 : i64} {
  func.func @_linear_kernel(%arg0: i32, %arg1: i32, %arg2: i32, %arg3: i32, %arg4: memref<32x128xbf16, #tpu.memory_space<vmem>>, %arg5: memref<1x128x128xbf16, #tpu.memory_space<vmem>>, %arg6: memref<1x1x128xf32, #tpu.memory_space<vmem>>, %arg7: memref<1x32x128xf32, #tpu.memory_space<vmem>>, %arg8: memref<32x128xf32, #tpu.memory_space<vmem>>) attributes {dimension_semantics = [#tpu.dimension_semantics<parallel>, #tpu.dimension_semantics<parallel>, #tpu.dimension_semantics<parallel>, #tpu.dimension_semantics<arbitrary>], iteration_bounds = array<i64: 1, 1, 1, 1>, scalar_prefetch = 0 : i64, scratch_operands = 1 : i64, tpu.core_type = #tpu.core_type<tc>, window_params = [{transform_indices = @transform_0, window_bounds = array<i64: 32, 128>}, {transform_indices = @transform_1, window_bounds = array<i64: 1, 128, 128>}, {transform_indices = @transform_2, window_bounds = array<i64: 1, 1, 128>}, {transform_indices = @transform_3, window_bounds = array<i64: 1, 32, 128>}]} {
    %c0_i32 = arith.constant 0 : i32
    %0 = arith.cmpi eq, %arg3, %c0_i32 : i32
    %1 = arith.extui %0 : i1 to i32
    %c0_i32_0 = arith.constant 0 : i32
    %2 = arith.cmpi ne, %1, %c0_i32_0 : i32
    scf.if %2 {
      %cst_11 = arith.constant 0.000000e+00 : f32
      %13 = vector.broadcast %cst_11 : f32 to vector<32x128xf32>
      %c0_12 = arith.constant 0 : index
      %c0_13 = arith.constant 0 : index
      %14 = vector.load %arg8[%c0_12, %c0_13] : memref<32x128xf32, #tpu.memory_space<vmem>>, vector<32x128xf32>
      tpu.vector_store %arg8[%c0_12, %c0_13], %13 {strides = array<i32>} : memref<32x128xf32, #tpu.memory_space<vmem>>, vector<32x128xf32>,
    } else {
    }
    %c0 = arith.constant 0 : index
    %c0_1 = arith.constant 0 : index
    %3 = vector.load %arg8[%c0, %c0_1] : memref<32x128xf32, #tpu.memory_space<vmem>>, vector<32x128xf32>
    %c0_2 = arith.constant 0 : index
    %c0_3 = arith.constant 0 : index
    %4 = vector.load %arg4[%c0_2, %c0_3] : memref<32x128xbf16, #tpu.memory_space<vmem>>, vector<32x128xbf16>
    %c0_4 = arith.constant 0 : index
    %c0_5 = arith.constant 0 : index
    %c0_6 = arith.constant 0 : index
    %5 = vector.load %arg5[%c0_4, %c0_5, %c0_6] : memref<1x128x128xbf16, #tpu.memory_space<vmem>>, vector<1x128x128xbf16>
    %6 = vector.shape_cast %5 : vector<1x128x128xbf16> to vector<128x128xbf16>
    %cst = arith.constant dense<0.000000e+00> : vector<32x128xf32>
    %7 = tpu.matmul %4, %6, %cst {dimension_numbers = #tpu.dot_dimension_numbers<[1], [0], [0], [1], [0, 0, 1, 1], [], []>} : vector<32x128xbf16>, vector<128x128xbf16>, vector<32x128xf32> -> vector<32x128xf32>
    %8 = arith.addf %3, %7 : vector<32x128xf32>
    %c0_7 = arith.constant 0 : index
    %c0_8 = arith.constant 0 : index
    %9 = vector.load %arg8[%c0_7, %c0_8] : memref<32x128xf32, #tpu.memory_space<vmem>>, vector<32x128xf32>
    tpu.vector_store %arg8[%c0_7, %c0_8], %8 {strides = array<i32>} : memref<32x128xf32, #tpu.memory_space<vmem>>, vector<32x128xf32>,
    %c0_i32_9 = arith.constant 0 : i32
    %10 = arith.cmpi eq, %arg3, %c0_i32_9 : i32
    %11 = arith.extui %10 : i1 to i32
    %c0_i32_10 = arith.constant 0 : i32
    %12 = arith.cmpi ne, %11, %c0_i32_10 : i32
    scf.if %12 {
      %c0_11 = arith.constant 0 : index
      %c0_12 = arith.constant 0 : index
      %13 = vector.load %arg8[%c0_11, %c0_12] : memref<32x128xf32, #tpu.memory_space<vmem>>, vector<32x128xf32>
      %c0_13 = arith.constant 0 : index
      %c0_14 = arith.constant 0 : index
      %c0_15 = arith.constant 0 : index
      %14 = vector.load %arg6[%c0_13, %c0_14, %c0_15] : memref<1x1x128xf32, #tpu.memory_space<vmem>>, vector<1x1x128xf32>
      %15 = vector.shape_cast %14 : vector<1x1x128xf32> to vector<1x128xf32>
      %16 = vector.broadcast %15 : vector<1x128xf32> to vector<32x128xf32>
      %17 = arith.addf %13, %16 : vector<32x128xf32>
      %c0_16 = arith.constant 0 : index
      %c0_17 = arith.constant 0 : index
      %c0_18 = arith.constant 0 : index
      %18 = vector.load %arg7[%c0_16, %c0_17, %c0_18] : memref<1x32x128xf32, #tpu.memory_space<vmem>>, vector<1x32x128xf32>
      %19 = vector.shape_cast %18 : vector<1x32x128xf32> to vector<32x128xf32>
      %20 = vector.shape_cast %17 : vector<32x128xf32> to vector<1x32x128xf32>
      tpu.vector_store %arg7[%c0_16, %c0_17, %c0_18], %20 {strides = array<i32>} : memref<1x32x128xf32, #tpu.memory_space<vmem>>, vector<1x32x128xf32>,
    } else {
    }
    return
  }
  func.func @transform_0(%arg0: i32, %arg1: i32, %arg2: i32, %arg3: i32) -> (i32, i32) {
    %c0_i32 = arith.constant 0 : i32
    return %arg1, %arg3 : i32, i32
  }
  func.func @transform_1(%arg0: i32, %arg1: i32, %arg2: i32, %arg3: i32) -> (i32, i32, i32) {
    %c0_i32 = arith.constant 0 : i32
    return %arg0, %arg3, %arg2 : i32, i32, i32
  }
  func.func @transform_2(%arg0: i32, %arg1: i32, %arg2: i32, %arg3: i32) -> (i32, i32, i32) {
    %c0_i32 = arith.constant 0 : i32
    %c0_i32_0 = arith.constant 0 : i32
    return %arg0, %c0_i32, %arg2 : i32, i32, i32
  }
  func.func @transform_3(%arg0: i32, %arg1: i32, %arg2: i32, %arg3: i32) -> (i32, i32, i32) {
    %c0_i32 = arith.constant 0 : i32
    return %arg0, %arg1, %arg2 : i32, i32, i32
  }
}

</mosaic_0001>

<bundles_post_ra>
// kernel: squeeze.11
= control target key start
LH: loop header
LB: loop body
LE: loop exit
PB: predicated region body
PF: predicated region fallthrough
CT: control target
= control target key end

     0   :  { %vm8_vm0 = vcmask 261120   ;;  %s40_s8 = smov 32   ;;  %s41_s9 = smov 64   ;;  %vm14_vm1 = vcmask 1048320   ;;  %vm20_vm2 = vcmask 785920   ;;  %vm26_vm3 = vcmask 523520   ;;  %s58_s0 = inlined_call_operand.vmem [shape: f32[4,32], index: 0, kind: input, shape index: {}]   ;;  %s59_s1 = inlined_call_operand.vmem [shape: f32[1,1,128], index: 1, kind: output, shape index: {}]  }
   0x1   :  { %v5_v0 = vld [vmem:[%s58_s0] sm:$0xf]  ;;  %s39_s0 = smov 96  }
   0x2   :  { %6 = vst [vmem:[#allocation1] sm:$0xf] %v5_v0 }
   0x9   :  { %v11_v1 = vld [vmem:[#allocation1 + $0x3] sm:$0x1]   ;;  %v23_v2 = vld [vmem:[#allocation1 + $0x1] sm:$0x1]   ;;  %v7_v3 = vld [vmem:[#allocation1] sm:$0x1]  }
   0xa   :  { %12 = vrot.lane.b32.xlu0 %v11_v1, %s39_s0  ;;  %24 = vrot.lane.b32.xlu1 %v23_v2, %s40_s8  ;;  %v17_v4 = vld [vmem:[#allocation1 + $0x2] sm:$0x1]   ;;  %9 = vst.msk [vmem:[#allocation0] sm:$0x1] %vm8_vm0, %v7_v3  }
   0xe   :  { %18 = vrot.lane.b32.xlu0 %v17_v4, %s41_s9 }
  0x7c   :  { %v13_v5 = vpop.permute.xlu0 %12   ;;  %v25_v6 = vpop.permute.xlu1 %24  }
  0x7d   :  { %15 = vst.msk [vmem:[#allocation0] sm:$0x1] %vm14_vm1, %v13_v5  }
  0x80   :  { %v19_v7 = vpop.permute.xlu0 %18  }
  0x81   :  { %21 = vst.msk [vmem:[#allocation0] sm:$0x1] %vm20_vm2, %v19_v7  }
  0x82   :  { %27 = vst.msk [vmem:[#allocation0] sm:$0x1] %vm26_vm3, %v25_v6  }
  0x89   :  { %v32_v8 = vld [vmem:[#allocation0] sm:$0x1] }
  0x8a   :  { %35 = vst [vmem:[%s59_s1] sm:$0x1] %v32_v8 }

// kernel: squeeze.14
= control target key start
LH: loop header
LB: loop body
LE: loop exit
PB: predicated region body
PF: predicated region fallthrough
CT: control target
= control target key end

     0   :  { %vm35_vm0 = vcmask 261120   ;;  %s279_s8 = smov 32   ;;  %s280_s9 = smov 64   ;;  %v281_v16 = vmov 0.0   ;;  %s359_s0 = inlined_call_operand.vmem [shape: bf16[1,16,128], index: 0, kind: input, shape index: {}]   ;;  %s360_s1 = inlined_call_operand.vmem [shape: bf16[16,4,32], index: 1, kind: output, shape index: {}]  }
   0x1   :  { %v256_v0 = vld [vmem:[%s359_s0] sm:$0xff]   ;;  %s278_s0 = smov 96  }
   0x2   :  { %v257_v1 = vunpack.c.l.bf16 %v256_v0  ;;  %v258_v2 = vunpack.c.h.bf16 %v256_v0 }
   0x4   :  { %42 = vst.msk [vmem:[#allocation0 + $0x40] ss:$8 sm:$0xf] %vm35_vm0, %v258_v2   ;;  %44 = vst.msk [vmem:[#allocation0 + $0x40] ss:$8 sm:$0xf0] %vm35_vm0, %v258_v2   ;;  %v263_v3 = vpack.i.bf16 %v258_v2, %v257_v1 }
   0x5   :  { %36 = vst.msk [vmem:[#allocation0] ss:$8 sm:$0xf] %vm35_vm0, %v257_v1   ;;  %37 = vst.msk [vmem:[#allocation0] ss:$8 sm:$0xf0] %vm35_vm0, %v257_v1  }
   0x6   :  { %264 = vrot.lane.b32.xlu0 %v263_v3, %s278_s0  ;;  %274 = vrot.lane.b32.xlu1 %v263_v3, %s279_s8 }
   0xa   :  { %269 = vrot.lane.b32.xlu0 %v263_v3, %s280_s9 }
  0x78   :  { %v265_v4 = vpop.permute.xlu0 %264  ;;  %v275_v5 = vpop.permute.xlu1 %274 }
  0x79   :  { %v267_v6 = vunpack.i.h.bf16 %v265_v4  ;;  %v266_v7 = vunpack.i.l.bf16 %v265_v4  ;;  %v277_v8 = vunpack.i.h.bf16 %v275_v5  ;;  %v276_v9 = vunpack.i.l.bf16 %v275_v5 }
  0x7b   :  { %59 = vst.msk [vmem:[#allocation0 + $0x41] ss:$8 sm:$0xf] %vm35_vm0, %v267_v6   ;;  %61 = vst.msk [vmem:[#allocation0 + $0x41] ss:$8 sm:$0xf0] %vm35_vm0, %v267_v6  }
  0x7c   :  { %50 = vst.msk [vmem:[#allocation0 + $0x1] ss:$8 sm:$0xf] %vm35_vm0, %v266_v7   ;;  %52 = vst.msk [vmem:[#allocation0 + $0x1] ss:$8 sm:$0xf0] %vm35_vm0, %v266_v7   ;;  %v270_v10 = vpop.permute.xlu0 %269 }
  0x7d   :  { %93 = vst.msk [vmem:[#allocation0 + $0x43] ss:$8 sm:$0xf] %vm35_vm0, %v277_v8   ;;  %95 = vst.msk [vmem:[#allocation0 + $0x43] ss:$8 sm:$0xf0] %vm35_vm0, %v277_v8   ;;  %v272_v11 = vunpack.i.h.bf16 %v270_v10  ;;  %v271_v12 = vunpack.i.l.bf16 %v270_v10 }
  0x7e   :  { %84 = vst.msk [vmem:[#allocation0 + $0x3] ss:$8 sm:$0xf] %vm35_vm0, %v276_v9   ;;  %86 = vst.msk [vmem:[#allocation0 + $0x3] ss:$8 sm:$0xf0] %vm35_vm0, %v276_v9  }
  0x7f   :  { %76 = vst.msk [vmem:[#allocation0 + $0x42] ss:$8 sm:$0xf] %vm35_vm0, %v272_v11   ;;  %78 = vst.msk [vmem:[#allocation0 + $0x42] ss:$8 sm:$0xf0] %vm35_vm0, %v272_v11  }
  0x80   :  { %67 = vst.msk [vmem:[#allocation0 + $0x2] ss:$8 sm:$0xf] %vm35_vm0, %v271_v12   ;;  %69 = vst.msk [vmem:[#allocation0 + $0x2] ss:$8 sm:$0xf0] %vm35_vm0, %v271_v12  }
  0x86   :  { %v162_v28 = vld [vmem:[#allocation0 + $0x40] sm:$0xf]  ;;  %v170_v32 = vld [vmem:[#allocation0 + $0x48] sm:$0xf]  ;;  %v178_v33 = vld [vmem:[#allocation0 + $0x50] sm:$0xf] }
  0x87   :  { %v130_v13 = vld [vmem:[#allocation0 + $0x20] sm:$0xf]  ;;  %v138_v14 = vld [vmem:[#allocation0 + $0x28] sm:$0xf]  ;;  %v146_v15 = vld [vmem:[#allocation0 + $0x30] sm:$0xf]  ;;  %v163_v31 = vpack.c.bf16 %v281_v16, %v162_v28  ;;  %v171_v35 = vpack.c.bf16 %v281_v16, %v170_v32  ;;  %v179_v36 = vpack.c.bf16 %v281_v16, %v178_v33 }
  0x88   :  { %v131_v17 = vpack.c.bf16 %v281_v16, %v130_v13  ;;  %v139_v18 = vpack.c.bf16 %v281_v16, %v138_v14  ;;  %v147_v19 = vpack.c.bf16 %v281_v16, %v146_v15  ;;  %v154_v20 = vld [vmem:[#allocation0 + $0x38] sm:$0xf]  ;;  %v101_v21 = vld [vmem:[#allocation0] sm:$0xf]  ;;  %v107_v22 = vld [vmem:[#allocation0 + $0x8] sm:$0xf] }
  0x89   :  { %v155_v23 = vpack.c.bf16 %v281_v16, %v154_v20  ;;  %v102_v24 = vpack.c.bf16 %v281_v16, %v101_v21  ;;  %v108_v25 = vpack.c.bf16 %v281_v16, %v107_v22  ;;  %v114_v26 = vld [vmem:[#allocation0 + $0x10] sm:$0xf]  ;;  %v122_v27 = vld [vmem:[#allocation0 + $0x18] sm:$0xf]  ;;  %v194_v38 = vld [vmem:[#allocation0 + $0x60] sm:$0xf] }
  0x8a   :  { %243 = vst [vmem:[%s360_s1 + $0x8] sm:$0x3] %v131_v17  ;;  %244 = vst [vmem:[%s360_s1 + $0xa] sm:$0x3] %v139_v18  ;;  %v115_v29 = vpack.c.bf16 %v281_v16, %v114_v26  ;;  %v123_v30 = vpack.c.bf16 %v281_v16, %v122_v27  ;;  %v186_v34 = vld [vmem:[#allocation0 + $0x58] sm:$0xf]  ;;  %v195_v41 = vpack.c.bf16 %v281_v16, %v194_v38 }
  0x8b   :  { %245 = vst [vmem:[%s360_s1 + $0xc] sm:$0x3] %v147_v19  ;;  %246 = vst [vmem:[%s360_s1 + $0xe] sm:$0x3] %v155_v23  ;;  %v187_v37 = vpack.c.bf16 %v281_v16, %v186_v34  ;;  %v202_v39 = vld [vmem:[#allocation0 + $0x68] sm:$0xf] }
  0x8c   :  { %105 = vst [vmem:[%s360_s1] sm:$0x3] %v102_v24  ;;  %240 = vst [vmem:[%s360_s1 + $0x2] sm:$0x3] %v108_v25  ;;  %v210_v40 = vld [vmem:[#allocation0 + $0x70] sm:$0xf]  ;;  %v203_v42 = vpack.c.bf16 %v281_v16, %v202_v39 }
  0x8d   :  { %241 = vst [vmem:[%s360_s1 + $0x4] sm:$0x3] %v115_v29  ;;  %242 = vst [vmem:[%s360_s1 + $0x6] sm:$0x3] %v123_v30  ;;  %v211_v43 = vpack.c.bf16 %v281_v16, %v210_v40  ;;  %v218_v44 = vld [vmem:[#allocation0 + $0x78] sm:$0xf] }
  0x8e   :  { %247 = vst [vmem:[%s360_s1 + $0x10] sm:$0x3] %v163_v31  ;;  %248 = vst [vmem:[%s360_s1 + $0x12] sm:$0x3] %v171_v35  ;;  %v219_v45 = vpack.c.bf16 %v281_v16, %v218_v44 }
  0x8f   :  { %249 = vst [vmem:[%s360_s1 + $0x14] sm:$0x3] %v179_v36  ;;  %250 = vst [vmem:[%s360_s1 + $0x16] sm:$0x3] %v187_v37 }
  0x90   :  { %251 = vst [vmem:[%s360_s1 + $0x18] sm:$0x3] %v195_v41  ;;  %252 = vst [vmem:[%s360_s1 + $0x1a] sm:$0x3] %v203_v42 }
  0x91   :  { %253 = vst [vmem:[%s360_s1 + $0x1c] sm:$0x3] %v211_v43  ;;  %254 = vst [vmem:[%s360_s1 + $0x1e] sm:$0x3] %v219_v45 }

// kernel: relative_self_attn_forward.4
= control target key start
LH: loop header
LB: loop body
LE: loop exit
PB: predicated region body
PF: predicated region fallthrough
CT: control target
= control target key end

     0   :  { %s777_s12 = smov 0   ;;  %s779_s13 = smov 0   ;;  %s824_s0 = inlined_call_operand.vmem [shape: bf16[32,128], index: 0, kind: input, shape index: {}]   ;;  %s825_s1 = inlined_call_operand.vmem [shape: bf16[3,128,128], index: 1, kind: input, shape index: {}]   ;;  %s826_s2 = inlined_call_operand.vmem [shape: f32[3,1,128], index: 2, kind: input, shape index: {}]   ;;  %s827_s3 = inlined_call_operand.vmem [shape: bf16[3,32,128], index: 3, kind: output, shape index: {}]  }
   0x1   :  { %s781_s14 = smov 0  }
   0x2 LB: > { %s39_s15 = sadd.s32 1, %s751_s13  ;;  %p630_p0 = scmp.ge.s32.totalorder %s755_s14, 1  ;;  %s755_s14 = sphi %s781_s14, %s13_s14   ;;  %s751_s13 = sphi %s779_s13, %s829_s13   ;;  %s747_s12 = sphi %s777_s12, %s828_s12  }
   0x3   : > { %p41_p1 = scmp.ge.s32.totalorder %s39_s15, 3  ;;  %p208_p2 = scmp.lt.s32.totalorder %s755_s14, 4 }
   0x5   : > { %s831_s15 = smov (%p41_p1, %s39_s15), 0  ;;  %p209_p3 = pnand %p630_p0, %p208_p2 }
   0x6   : > { %p270_p4 = scmp.lt.s32.totalorder (!%p209_p3), %s747_s12, 2 }
   0x7   : > { %212 = sbr.rel (%p209_p3) target bundleno = 252 (0xfc), region = 32 }
   0xc   : > { %v731_v0 = vld [vmem:[%s824_s0] sm:$0xff]   ;;  %s833_s12 = smov (!%p270_p4, %s747_s12), 2  ;;  %v732_v9 = vld [vmem:[%s824_s0 + $0x8] sm:$0xff]  }
   0xd   : > { %695 = vmatprep.mubr.bf16.mxu0 %v731_v0  ;;  %s652_s18 = sshll.u32 %s833_s12, 6  ;;  %s287_s26 = scalar_lea.vmem %s826_s2, %s833_s12 }
   0xe   : > { %s280_s21 = scalar_lea.vmem %s825_s1, %s652_s18  ;;  %v645_v11 = vld [vmem:[%s287_s26] ss:$0 sm:$0xff]  ;;  %s653_s27 = sshll.u32 %s833_s12, 4 }
   0xf   : > { %v723_v1 = vld [vmem:[%s280_s21 + $0x38] sm:$0xff]   ;;  %v724_v2 = vld [vmem:[%s280_s21 + $0x30] sm:$0xff]   ;;  %v725_v3 = vld [vmem:[%s280_s21 + $0x28] sm:$0xff]   ;;  %s299_s30 = scalar_lea.vmem %s827_s3, %s653_s27 }
  0x10   : > { %679 = vmatprep.subr.bf16.mxu0 %v723_v1  ;;  %v726_v4 = vld [vmem:[%s280_s21 + $0x20] sm:$0xff]   ;;  %v727_v5 = vld [vmem:[%s280_s21 + $0x18] sm:$0xff]   ;;  %v728_v6 = vld [vmem:[%s280_s21 + $0x10] sm:$0xff]  }
  0x11   : > { %680 = vmatpush3.bf16.msra.mxu0 %v723_v1  ;;  %v729_v7 = vld [vmem:[%s280_s21 + $0x8] sm:$0xff]   ;;  %v730_v8 = vld [vmem:[%s280_s21] sm:$0xff]  }
  0x12   : > { %681 = vmatprep.subr.bf16.mxu0 %v724_v2 }
  0x15   : > { %682 = vmatpush3.bf16.msra.mxu0 %v724_v2 }
  0x16   : > { %683 = vmatprep.subr.bf16.mxu0 %v725_v3 }
  0x19   : > { %684 = vmatpush3.bf16.msra.mxu0 %v725_v3 }
  0x1a   : > { %685 = vmatprep.subr.bf16.mxu0 %v726_v4 }
  0x1d   : > { %686 = vmatpush3.bf16.msra.mxu0 %v726_v4 }
  0x1e   : > { %687 = vmatprep.subr.bf16.mxu0 %v727_v5 }
  0x21   : > { %688 = vmatpush3.bf16.msra.mxu0 %v727_v5 }
  0x22   : > { %689 = vmatprep.subr.bf16.mxu0 %v728_v6 }
  0x25   : > { %690 = vmatpush3.bf16.msra.mxu0 %v728_v6 }
  0x26   : > { %691 = vmatprep.subr.bf16.mxu0 %v729_v7 }
  0x29   : > { %692 = vmatpush3.bf16.msra.mxu0 %v729_v7 }
  0x2a   : > { %693 = vmatprep.subr.bf16.mxu0 %v730_v8 }
  0x2d   : > { %694 = vmatpush3.bf16.msra.mxu0 %v730_v8 }
  0x30   : > { %696 = vmatmul.mubr.bf16.vlgmr.msra.gmra.mxu0 %v732_v9 }
  0xf0   : > { %v697_v10 = vpop.f32.mrf.mxu0 }
  0xf1   : > { %v467_v14 = vadd.f32 %v697_v10, %v645_v11 }
  0xf2   : > { %v428_v12 = vpop.f32.mrf.mxu0 }
  0xf3   : > { %v465_v17 = vadd.f32 %v645_v11, %v428_v12 }
  0xf4   : > { %v698_v13 = vpop.f32.mrf.mxu0 }
  0xf5   : > { %v468_v15 = vadd.f32 %v698_v13, %v645_v11 }
  0xf6   : > { %v431_v16 = vpop.f32.mrf.mxu0 }
  0xf7   : > { %v666_v18 = vpack.c.bf16 %v468_v15, %v467_v14  ;;  %v466_v19 = vadd.f32 %v645_v11, %v431_v16 }
  0xf9   : > { %668 = vst [vmem:[%s299_s30 + $0x8] sm:$0xff] %v666_v18   ;;  %v661_v20 = vpack.c.bf16 %v466_v19, %v465_v17 }
  0xfb   : > { %662 = vst [vmem:[%s299_s30] sm:$0xff] %v661_v20  }
  0xfc PF: > { %s13_s14 = sadd.s32 1, %s755_s14   ;;  %s828_s12 = smov %s751_s13 }
  0xfd   : > { %p10_p5 = scmp.ge.s32.totalorder %s13_s14, 5   ;;  %s829_s13 = smov %s831_s15 }
  0xff   :  { %12 = sbr.rel (!%p10_p5) target bundleno = 2 (0x2), region = 76 }

// kernel: relative_self_attn_forward.5
= control target key start
LH: loop header
LB: loop body
LE: loop exit
PB: predicated region body
PF: predicated region fallthrough
CT: control target
= control target key end

     0   :  { %v227_v0 = vmov 0.0   ;;  %vm228_vm0 = vmmov 0   ;;  %s282_s1 = inlined_call_operand.vmem [shape: bf16[1,128,128], index: 1, kind: input, shape index: {}]   ;;  %s283_s0 = inlined_call_operand.vmem [shape: bf16[16,128], index: 0, kind: input, shape index: {}]   ;;  %s284_s2 = inlined_call_operand.vmem [shape: f32[1,1,128], index: 2, kind: input, shape index: {}]   ;;  %s285_s3 = inlined_call_operand.vmem [shape: bf16[1,16,128], index: 3, kind: output, shape index: {}]  }
   0x1   :  { %196 = vmatprep.subr.bf16.mxu0 %v227_v0  ;;  %v218_v1 = vld [vmem:[%s282_s1 + $0x38] sm:$0xff]   ;;  %212 = vmatprep.mubr.msk.bf16.mxu0 %vm228_vm0, %v227_v0  ;;  %v219_v2 = vld [vmem:[%s282_s1 + $0x30] sm:$0xff]   ;;  %v220_v3 = vld [vmem:[%s282_s1 + $0x28] sm:$0xff]  }
   0x2   :  { %197 = vmatpush3.bf16.msra.mxu0 %v218_v1  ;;  %v221_v4 = vld [vmem:[%s282_s1 + $0x20] sm:$0xff]   ;;  %v222_v5 = vld [vmem:[%s282_s1 + $0x18] sm:$0xff]   ;;  %v223_v6 = vld [vmem:[%s282_s1 + $0x10] sm:$0xff]  }
   0x3   :  { %198 = vmatprep.subr.bf16.mxu0 %v227_v0  ;;  %v224_v7 = vld [vmem:[%s282_s1 + $0x8] sm:$0xff]   ;;  %v225_v8 = vld [vmem:[%s282_s1] sm:$0xff]  }
   0x4   :  { %v226_v9 = vld [vmem:[%s283_s0] sm:$0xff]  }
   0x5   :  { %v177_v11 = vld [vmem:[%s284_s2] ss:$0 sm:$0xff] }
   0x6   :  { %199 = vmatpush3.bf16.msra.mxu0 %v219_v2 }
   0x7   :  { %200 = vmatprep.subr.bf16.mxu0 %v227_v0 }
   0xa   :  { %201 = vmatpush3.bf16.msra.mxu0 %v220_v3 }
   0xb   :  { %202 = vmatprep.subr.bf16.mxu0 %v227_v0 }
   0xe   :  { %203 = vmatpush3.bf16.msra.mxu0 %v221_v4 }
   0xf   :  { %204 = vmatprep.subr.bf16.mxu0 %v227_v0 }
  0x12   :  { %205 = vmatpush3.bf16.msra.mxu0 %v222_v5 }
  0x13   :  { %206 = vmatprep.subr.bf16.mxu0 %v227_v0 }
  0x16   :  { %207 = vmatpush3.bf16.msra.mxu0 %v223_v6 }
  0x17   :  { %208 = vmatprep.subr.bf16.mxu0 %v227_v0 }
  0x1a   :  { %209 = vmatpush3.bf16.msra.mxu0 %v224_v7 }
  0x1b   :  { %210 = vmatprep.subr.bf16.mxu0 %v227_v0 }
  0x1e   :  { %211 = vmatpush3.bf16.msra.mxu0 %v225_v8 }
  0x21   :  { %213 = vmatmul.mubr.bf16.vlgmr.msra.gmra.mxu0 %v226_v9 }
  0xe1   :  { %v129_v10 = vpop.f32.mrf.mxu0 }
  0xe2   :  { %v152_v14 = vadd.f32 %v177_v11, %v129_v10 }
  0xe3   :  { %v214_v12 = vpop.f32.mrf.mxu0 }
  0xe5   :  { %v132_v13 = vpop.f32.mrf.mxu0 }
  0xe6   :  { %v153_v15 = vadd.f32 %v177_v11, %v132_v13 }
  0xe7   :  { %v215_v16 = vpop.f32.mrf.mxu0 }
  0xe8   :  { %v185_v17 = vpack.c.bf16 %v153_v15, %v152_v14 }
  0xea   :  { %186 = vst [vmem:[%s285_s3] sm:$0xff] %v185_v17  }

// kernel: relative_self_attn_forward.7
= control target key start
LH: loop header
LB: loop body
LE: loop exit
PB: predicated region body
PF: predicated region fallthrough
CT: control target
= control target key end

     0   :  { %s306_s1 = inlined_call_operand.vmem [shape: bf16[1,128,128], index: 1, kind: input, shape index: {}]   ;;  %s307_s0 = inlined_call_operand.vmem [shape: bf16[32,128], index: 0, kind: input, shape index: {}]   ;;  %s308_s2 = inlined_call_operand.vmem [shape: f32[1,1,128], index: 2, kind: input, shape index: {}]   ;;  %s309_s3 = inlined_call_operand.vmem [shape: f32[1,32,128], index: 3, kind: output, shape index: {}]  }
   0x1   :  { %v231_v0 = vld [vmem:[%s306_s1 + $0x38] sm:$0xff]   ;;  %v232_v1 = vld [vmem:[%s306_s1 + $0x30] sm:$0xff]   ;;  %v233_v2 = vld [vmem:[%s306_s1 + $0x28] sm:$0xff]  }
   0x2   :  { %211 = vmatprep.subr.bf16.mxu0 %v231_v0  ;;  %v234_v3 = vld [vmem:[%s306_s1 + $0x20] sm:$0xff]   ;;  %v235_v5 = vld [vmem:[%s306_s1 + $0x18] sm:$0xff]   ;;  %v236_v6 = vld [vmem:[%s306_s1 + $0x10] sm:$0xff]  }
   0x3   :  { %212 = vmatpush3.bf16.msra.mxu0 %v231_v0  ;;  %v239_v4 = vld [vmem:[%s307_s0] sm:$0xff]   ;;  %v237_v7 = vld [vmem:[%s306_s1 + $0x8] sm:$0xff]  }
   0x4   :  { %213 = vmatprep.subr.bf16.mxu0 %v232_v1  ;;  %227 = vmatprep.mubr.bf16.mxu0 %v239_v4  ;;  %v238_v8 = vld [vmem:[%s306_s1] sm:$0xff]   ;;  %v240_v9 = vld [vmem:[%s307_s0 + $0x8] sm:$0xff]  }
   0x5   :  { %v200_v10 = vld [vmem:[%s308_s2] ss:$0 sm:$0xff] }
   0x7   :  { %214 = vmatpush3.bf16.msra.mxu0 %v232_v1 }
   0x8   :  { %215 = vmatprep.subr.bf16.mxu0 %v233_v2 }
   0xb   :  { %216 = vmatpush3.bf16.msra.mxu0 %v233_v2 }
   0xc   :  { %217 = vmatprep.subr.bf16.mxu0 %v234_v3 }
   0xf   :  { %218 = vmatpush3.bf16.msra.mxu0 %v234_v3 }
  0x10   :  { %219 = vmatprep.subr.bf16.mxu0 %v235_v5 }
  0x13   :  { %220 = vmatpush3.bf16.msra.mxu0 %v235_v5 }
  0x14   :  { %221 = vmatprep.subr.bf16.mxu0 %v236_v6 }
  0x17   :  { %222 = vmatpush3.bf16.msra.mxu0 %v236_v6 }
  0x18   :  { %223 = vmatprep.subr.bf16.mxu0 %v237_v7 }
  0x1b   :  { %224 = vmatpush3.bf16.msra.mxu0 %v237_v7 }
  0x1c   :  { %225 = vmatprep.subr.bf16.mxu0 %v238_v8 }
  0x1f   :  { %226 = vmatpush3.bf16.msra.mxu0 %v238_v8 }
  0x22   :  { %228 = vmatmul.mubr.bf16.vlgmr.msra.gmra.mxu0 %v240_v9 }
  0xe2   :  { %v229_v11 = vpop.f32.mrf.mxu0 }
  0xe3   :  { %v180_v12 = vadd.f32 %v229_v11, %v200_v10 }
  0xe4   :  { %v141_v13 = vpop.f32.mrf.mxu0 }
  0xe5   :  { %184 = vst [vmem:[%s309_s3 + $0x10] sm:$0xff] %v180_v12  ;;  %v178_v14 = vadd.f32 %v200_v10, %v141_v13 }
  0xe6   :  { %v230_v15 = vpop.f32.mrf.mxu0 }
  0xe7   :  { %182 = vst [vmem:[%s309_s3] sm:$0xff] %v178_v14  ;;  %v181_v16 = vadd.f32 %v230_v15, %v200_v10 }
  0xe8   :  { %v144_v17 = vpop.f32.mrf.mxu0 }
  0xe9   :  { %185 = vst [vmem:[%s309_s3 + $0x18] sm:$0xff] %v181_v16  ;;  %v179_v18 = vadd.f32 %v200_v10, %v144_v17 }
  0xeb   :  { %183 = vst [vmem:[%s309_s3 + $0x8] sm:$0xff] %v179_v18 }

// kernel: relative_self_attn_forward.6
= control target key start
LH: loop header
LB: loop body
LE: loop exit
PB: predicated region body
PF: predicated region fallthrough
CT: control target
= control target key end

     0   :  { %13 = vsyncpa [#allocation3], 0  ;;  %s1606_s0 = inlined_call_operand.vmem [shape: bf16[3,2,4,16,32], index: 0, kind: input, shape index: {}, may-alias: {0,1,2}]   ;;  %s1607_s1 = inlined_call_operand.vmem [shape: bf16[3,2,4,16,32], index: 1, kind: input, shape index: {}, may-alias: {0,1,2}]   ;;  %s1608_s2 = inlined_call_operand.vmem [shape: bf16[3,2,4,16,32], index: 2, kind: input, shape index: {}, may-alias: {0,1,2}]   ;;  %s1609_s3 = inlined_call_operand.vmem [shape: bf16[4,1,32], index: 3, kind: input, shape index: {}]   ;;  %s1610_s4 = inlined_call_operand.vmem [shape: bf16[4,1,32], index: 4, kind: input, shape index: {}]   ;;  %s1611_s5 = inlined_call_operand.vmem [shape: bf16[4,17,32], index: 5, kind: input, shape index: {}]   ;;  %s1612_s6 = inlined_call_operand.hbm [shape: bf16[2,4,16,16], index: 6, kind: output, shape index: {0}]   ;;  %s1613_s7 = inlined_call_operand.vmem [shape: bf16[2,4,16,32], index: 7, kind: output, shape index: {1}]  }
   0x1   :  { %15 = vsyncpa [#allocation3 + $0x1], 0  ;;  %s1382_s24 = smov 0   ;;  %s1384_s25 = smov 0  }
   0x2   :  { %s1386_s26 = smov 0   ;;  %s1388_s27 = smov 0  }
   0x3   :  { %s1390_s28 = smov 0   ;;  %s1392_s29 = smov 0  }
   0x4   :  { %s1394_s30 = smov 0   ;;  %s1396_s8 = smov 0  }
   0x5 LB: > { %1617 = sst [smem:[#allocation5_spill]] %s1322_s30  ;;  %s1062_s9 = sadd.s32 4294967295, %s1326_s8   ;;  %s1326_s8 = sphi %s1396_s8, %s21_s8   ;;  %s1322_s30 = sphi %s1394_s30, %s1630_s30   ;;  %s1318_s29 = sphi %s1392_s29, %s1629_s29   ;;  %s1314_s28 = sphi %s1390_s28, %s1622_s28   ;;  %s1310_s27 = sphi %s1388_s27, %s1628_s27   ;;  %s1306_s26 = sphi %s1386_s26, %s1627_s26   ;;  %s1302_s25 = sphi %s1384_s25, %s1626_s25   ;;  %s1298_s24 = sphi %s1382_s24, %s1625_s24  }
   0x6   : > { %s1063_s10 = sadd.s32 4294967294, %s1326_s8   ;;  %s30_s11 = sadd.s32 1, %s1318_s29 }
   0x7   : > { %p31_p0 = scmp.ge.s32.totalorder %s30_s11, 4  ;;  %s33_s12 = sadd.s32 1, %s1322_s30 }
   0x8   : > { %p214_p1 = scmp.ne.s32.totalorder %s1306_s26, %s1302_s25  ;;  %p215_p2 = scmp.eq.s32.totalorder %s1062_s9, 7 }
   0x9   : > { %s1632_s11 = smov (%p31_p0, %s30_s11), 0  ;;  %s1634_s12 = smov (!%p31_p0, %s33_s12), %s1322_s30 }
   0xa   : > { %1618 = sst [smem:[#allocation6_spill]] %s1632_s11  ;;  %s200_s13 = ssub.s32 %s1318_s29, %s1632_s11 }
   0xb   : > { %p1433_p3 = por %p215_p2, %p214_p1  ;;  %p35_p4 = scmp.ge.s32.totalorder %s1634_s12, 2 }
   0xc   : > { %p220_p5 = scmp.ne.s32.totalorder %s1302_s25, %s1298_s24  ;;  %p221_p6 = scmp.eq.s32.totalorder %s1063_s10, 7 }
   0xd   : > { %p1066_p7 = scmp.ge.s32.totalorder %s1326_s8, 1  ;;  %s1636_s12 = smov (%p35_p4, %s1634_s12), 0 }
   0xe   : > { %1620 = sst [smem:[#allocation7_spill]] %s1636_s12  ;;  %p1442_p8 = por %p221_p6, %p220_p5 }
   0xf   : > { %p325_p9 = scmp.lt.s32.totalorder %s1326_s8, 9  ;;  %s199_s16 = ssub.s32 %s1322_s30, %s1636_s12 }
  0x10   : > { %s204_s17 = sadd.s32 1, %s1306_s26  ;;  %s201_s18 = sor.u32 %s200_s13, %s199_s16 }
  0x11   : > { %p326_p10 = pnand %p1066_p7, %p325_p9  ;;  %p202_p11 = scmp.eq.s32.totalorder %s201_s18, 0 }
  0x12   : > { %p403_p12 = scmp.lt.s32.totalorder (!%p326_p10), %s1310_s27, 3  ;;  %p401_p13 = scmp.lt.s32.totalorder (!%p326_p10), %s1314_s28, 1 }
  0x13   : > { %s1451_s19 = scalar_select %p202_p11, %s1306_s26, %s204_s17  }
  0x14   : > { %329 = sbr.rel (%p326_p10) target bundleno = 1369 (0x559), region = 44  ;;  %s1334_s13 = smov (!%p326_p10), 32  }
  0x15   : > { %s387_s17 = sand.u32 (!%p326_p10), 1, %s1302_s25   ;;  %s1101_s10 = sshll.u32 (!%p326_p10), %s1310_s27, 1 }
  0x19   : > { %v465_v0 = vlaneseq  ;;  %v1328_v1 = vmov 0.0   ;;  %vm1329_vm0 = vmmov 0   ;;  %s1459_s20 = scalar_select %p403_p12, %s1310_s27, 3  ;;  %vm485_vm1 = vcmask 261120  }
  0x1a   : > { %1123 = vmatprep.subr.bf16.mxu1 %v1328_v1  ;;  %1127 = vmatprep.mubr.msk.bf16.mxu1 %vm1329_vm0, %v1328_v1  ;;  %s402_s21 = scalar_select %p401_p13, %s1314_s28, 1  ;;  %vm615_vm2 = vcmask 1046528   ;;  %vm628_vm3 = vcmask 138240   ;;  %vm650_vm4 = vcmask 269312   ;;  %vm697_vm9 = vcmask 244736  }
  0x1b   : > { %v1461_v2 = vshrl.u32 %v465_v0, 7  ;;  %1117 = vmatprep.subr.bf16.mxu0 %v1328_v1  ;;  %1119 = vmatprep.mubr.msk.bf16.mxu0 %vm1329_vm0, %v1328_v1  ;;  %s1137_s22 = smul.u32 12, %s1459_s20  ;;  %s1068_s23 = sshll.u32 %s1459_s20, 1  ;;  %vm722_vm12 = vcmask 211968   ;;  %vm735_vm14 = vcmask 130048  }
  0x1c   : > { %s1069_s9 = sshll.u32 %s402_s21, 3  ;;  %s435_s16 = scalar_lea.vmem %s1610_s4, %s1459_s20 }
  0x1d   : > { %v467_v3 = vsub.s32 0, %v1461_v2  ;;  %s440_s12 = scalar_lea.vmem %s1611_s5, %s1137_s22  ;;  %s407_s11 = sadd.s32 %s1069_s9, %s1068_s23  ;;  %v458_v4 = vld [vmem:[%s435_s16] sm:$0x1]  ;;  %v1496_v31 = vsub.s32 15, %v1461_v2  ;;  %v633_v33 = vadd.s32 8, %v1461_v2 }
  0x1e   : > { %v1222_v5 = vld [vmem:[%s440_s12 + $0x8] ss:$0 sps:$4 sm:$0x11]   ;;  %v536_v6 = vpack.i.b16 %v458_v4, %v458_v4  ;;  %s1477_s30 = sshll.u32 %s407_s11, 2  ;;  %v1223_v9 = vld [vmem:[%s440_s12] sm:$0xff]   ;;  %s1330_s11 = smov 17  }
  0x1f   : > { %v568_v7 = vsel %vm485_vm1, %v1222_v5, 0  ;;  %s409_s22 = scalar_lea.vmem %s1606_s0, %s1477_s30  ;;  %v565_v13 = vsel %vm485_vm1, %v1223_v9, 0  ;;  %s1331_s12 = smov 33   ;;  %v653_v32 = vand.u32 1, %v1496_v31  ;;  %v1500_v34 = vsub.s32 15, %v633_v33 }
  0x20   : > { %v541_v8 = vrot.slane %v536_v6, %v467_v3  ;;  %1124 = vmatpush3.bf16.xpose.msra.mxu1 %v568_v7  ;;  %v1487_v11 = vld [vmem:[%s409_s22] sm:$0xf]  ;;  %v1489_v12 = vld [vmem:[%s409_s22 + $0x4] sm:$0xf]  ;;  %s1332_s23 = smov 127   ;;  %s1333_s9 = smov 126  }
  0x21   : > { %1125 = vmatprep.subr.bf16.mxu1 %v1328_v1  ;;  %vm655_vm5 = vcmp.eq.s32.totalorder %v653_v32, 1  ;;  %v654_v39 = vand.u32 1, %v1500_v34  ;;  %s953_s18 = scalar_lea.vmem %s1607_s1, %s1477_s30  ;;  %s432_s22 = scalar_lea.vmem %s1609_s3, %s1459_s20  ;;  %v675_v53 = vshra.s32 %v1496_v31, 1  ;;  %v676_v56 = vshra.s32 %v1500_v34, 1 }
  0x22   : > { %v1089_v10 = vcombine.low %v541_v8, %v541_v8  ;;  %v1224_v43 = vld [vmem:[%s953_s18 + $0x40] sm:$0xff]   ;;  %s1335_s20 = smov 124   ;;  %v700_v2 = vshra.s32 %v1496_v31, 2  ;;  %v701_v8 = vshra.s32 %v1500_v34, 2  ;;  %s959_s16 = scalar_lea.vmem %s1608_s2, %s1477_s30 }
  0x23   : > { %vm656_vm6 = vcmp.eq.s32.totalorder %v654_v39, 1  ;;  %v457_v45 = vld [vmem:[%s432_s22] sm:$0x1]  ;;  %v490_v46 = vsel %vm485_vm1, %v1224_v43, 0  ;;  %v677_v54 = vand.u32 1, %v675_v53  ;;  %v678_v60 = vand.u32 1, %v676_v56 }
  0x24   : > { %v546_v14 = vadd.bf16 %v1089_v10, %v1487_v11  ;;  %v547_v15 = vadd.bf16 %v1089_v10, %v1489_v12  ;;  %v463_v47 = vpack.i.b16 %v457_v45, %v457_v45  ;;  %1118 = vmatpush3.bf16.xpose.msra.mxu0 %v490_v46  ;;  %v702_v5 = vand.u32 1, %v700_v2  ;;  %v1225_v45 = vld [vmem:[%s959_s16 + $0x80] sm:$0xff]   ;;  %s1067_s18 = sshll.u32 %s387_s17, 3  ;;  %s1102_s22 = sshll.u32 %s1314_s28, 3 }
  0x25   : > { %1131 = vmatprep.subr.bf16.mxu0 %v1328_v1  ;;  %vm679_vm7 = vcmp.eq.s32.totalorder %v677_v54, 1  ;;  %vm680_vm8 = vcmp.eq.s32.totalorder %v678_v60, 1  ;;  %s389_s21 = scalar_lea.vmem [#allocation2], %s1067_s18  ;;  %s1551_s16 = scalar_lea.sflag [#allocation3], %s387_s17 }
  0x26   : > { %v1090_v16 = vcombine.low %v546_v14, %v547_v15  ;;  %v468_v48 = vrot.slane %v463_v47, %v467_v3  ;;  %vm704_vm10 = vcmp.eq.s32.totalorder %v702_v5, 1  ;;  %s1339_s27 = smov [#allocation2]  }
  0x27   : > { %s1238_s28 = sshll.u32 %s1339_s27, 4  ;;  %s1239_s28 = int_to_ptr.vmem [resolvable:$false] %s1238_s28 }
  0x28   : > { %1126 = vmatpush3.bf16.xpose.msra.mxu1 %v565_v13  ;;  %v1085_v49 = vcombine.low %v468_v48, %v468_v48 }
  0x2a   : > { %v473_v50 = vadd.bf16 %v1085_v49, %v1487_v11  ;;  %v474_v51 = vadd.bf16 %v1085_v49, %v1489_v12  ;;  %v703_v12 = vand.u32 1, %v701_v8 }
  0x2c   : > { %v1086_v52 = vcombine.low %v473_v50, %v474_v51  ;;  %vm705_vm11 = vcmp.eq.s32.totalorder %v703_v12, 1 }
  0x2e   : > { %1120 = vmatmul.mubr.msk.bf16.vlgmr.msra.gmra.mxu0 %vm485_vm1, %v1086_v52 }
  0x2f   : > { %1128 = vmatmul.mubr.msk.bf16.vlgmr.msra.gmra.mxu1 %vm485_vm1, %v1090_v16  ;;  %1133 = vmatprep.mubr.msk.bf16.mxu0 %vm1329_vm0, %v1328_v1  ;;  %vm766_vm0 = vcmask 125952  }
  0x30   : > { %1132 = vmatpush3.bf16.msra.mxu0 %v1225_v45 }
  0xee   : > { %v526_v1 = vpop.f32.mrf.mxu0 }
  0xef   : > { %v604_v17 = vpop.f32.mrf.mxu1 }
  0xf0   : > { %v611_v19 = vmul.f32 0.17677669, %v604_v17  ;;  %v1121_v3 = vpop.f32.mrf.mxu0  ;;  %v725_v17 = vshra.s32 %v1496_v31, 3 }
  0xf1   : > { %v1129_v18 = vpop.f32.mrf.mxu1 }
  0xf2   : > { %v616_v23 = vrot.slane %v611_v19, 1  ;;  %v529_v4 = vpop.f32.mrf.mxu0  ;;  %v727_v18 = vand.u32 1, %v725_v17 }
  0xf3   : > { %v607_v20 = vpop.f32.mrf.mxu1 }
  0xf4   : > { %v612_v21 = vmul.f32 0.17677669, %v607_v20  ;;  %v1122_v7 = vpop.f32.mrf.mxu0  ;;  %v533_v20 = vmul.f32 0.17677669, %v526_v1  ;;  %vm729_vm13 = vcmp.eq.s32.totalorder %v727_v18, 1 }
  0xf5   : > { %v1130_v22 = vpop.f32.mrf.mxu1 }
  0xf6   : > { %v617_v24 = vrot.slane %v612_v21, 1 }
  0xf8   : > { %v618_v25 = vsel %vm615_vm2, %v616_v23, %v617_v24  ;;  %v620_v26 = vsel %vm615_vm2, %v617_v24, %v612_v21 }
  0xf9   : > { %622 = vrot.lane.b32.xlu0 %v618_v25, %s1330_s11 }
  0xfd   : > { %624 = vrot.lane.b32.xlu0 %v620_v26, %s1330_s11  ;;  %s1336_s11 = smov 30  }
 0x16b   : > { %v623_v27 = vpop.permute.xlu0 %622 }
 0x16c   : > { %v629_v28 = vsel %vm628_vm3, %v611_v19, %v623_v27 }
 0x16d   : > { %644 = vrot.lane.b32.xlu0 %v629_v28, %s1331_s12  ;;  %638 = vrot.lane.b32.xlu1 %v629_v28, %s1332_s23 }
 0x16f   : > { %v625_v29 = vpop.permute.xlu0 %624 }
 0x170   : > { %v630_v30 = vsel %vm628_vm3, %v612_v21, %v625_v29  ;;  %v726_v21 = vshra.s32 %v1500_v34, 3 }
 0x171   : > { %640 = vrot.lane.b32.xlu1 %v630_v30, %s1332_s23  ;;  %s1338_s23 = smov 26  }
 0x172   : > { %v728_v26 = vand.u32 1, %v726_v21 }
 0x174   : > { %vm730_vm15 = vcmp.eq.s32.totalorder %v728_v26, 1 }
 0x175   : > { %646 = vrot.lane.b32.xlu1 %v630_v30, %s1331_s12  ;;  %s1337_s12 = smov 120  }
 0x1df   : > { %v639_v35 = vpop.permute.xlu1 %638  ;;  %v645_v36 = vpop.permute.xlu0 %644 }
 0x1e0   : > { %v651_v37 = vsel %vm650_vm4, %v639_v35, %v645_v36 }
 0x1e1   : > { %v657_v38 = vsel %vm655_vm5, %v651_v37, %v629_v28 }
 0x1e2   : > { %661 = vrot.lane.b32.xlu0 %v657_v38, %s1333_s9 }
 0x1e3   : > { %v641_v40 = vpop.permute.xlu1 %640 }
 0x1e6   : > { %667 = vrot.lane.b32.xlu0 %v657_v38, %s1334_s13 }
 0x1e7   : > { %v647_v41 = vpop.permute.xlu1 %646 }
 0x1e8   : > { %v652_v42 = vsel %vm650_vm4, %v641_v40, %v647_v41 }
 0x1e9   : > { %v658_v44 = vsel %vm656_vm6, %v652_v42, %v630_v30  ;;  %v534_v30 = vmul.f32 0.17677669, %v529_v4 }
 0x1ea   : > { %663 = vrot.lane.b32.xlu1 %v658_v44, %s1333_s9 }
 0x1ee   : > { %669 = vrot.lane.b32.xlu1 %v658_v44, %s1334_s13 }
 0x254   : > { %v662_v55 = vpop.permute.xlu0 %661 }
 0x258   : > { %v668_v57 = vpop.permute.xlu0 %667 }
 0x259   : > { %v673_v58 = vsel %vm485_vm1, %v662_v55, %v668_v57 }
 0x25a   : > { %v681_v59 = vsel %vm679_vm7, %v673_v58, %v657_v38 }
 0x25b   : > { %685 = vrot.lane.b32.xlu0 %v681_v59, %s1335_s20 }
 0x25c   : > { %v664_v61 = vpop.permute.xlu1 %663 }
 0x25f   : > { %691 = vrot.lane.b32.xlu0 %v681_v59, %s1336_s11 }
 0x260   : > { %v670_v62 = vpop.permute.xlu1 %669 }
 0x261   : > { %v674_v63 = vsel %vm485_vm1, %v664_v61, %v670_v62 }
 0x262   : > { %v682_v0 = vsel %vm680_vm8, %v674_v63, %v658_v44 }
 0x263   : > { %687 = vrot.lane.b32.xlu1 %v682_v0, %s1335_s20  ;;  %s852_s20 = sadd.s32 %s1102_s22, %s1101_s10 }
 0x267   : > { %693 = vrot.lane.b32.xlu1 %v682_v0, %s1336_s11  ;;  %s1103_s11 = sshll.u32 %s852_s20, 6 }
 0x268   : > { %s1547_s13 = scalar_lea.hbm %s1612_s6, %s1103_s11 }
 0x2cd   : > { %v686_v6 = vpop.permute.xlu0 %685 }
 0x2d1   : > { %v692_v9 = vpop.permute.xlu0 %691 }
 0x2d2   : > { %v698_v10 = vsel %vm697_vm9, %v686_v6, %v692_v9 }
 0x2d3   : > { %v706_v11 = vsel %vm704_vm10, %v698_v10, %v681_v59 }
 0x2d4   : > { %710 = vrot.lane.b32.xlu0 %v706_v11, %s1337_s12 }
 0x2d5   : > { %v688_v13 = vpop.permute.xlu1 %687 }
 0x2d8   : > { %716 = vrot.lane.b32.xlu0 %v706_v11, %s1338_s23 }
 0x2d9   : > { %v694_v14 = vpop.permute.xlu1 %693 }
 0x2da   : > { %v699_v15 = vsel %vm697_vm9, %v688_v13, %v694_v14 }
 0x2db   : > { %v707_v16 = vsel %vm705_vm11, %v699_v15, %v682_v0 }
 0x2dc   : > { %712 = vrot.lane.b32.xlu1 %v707_v16, %s1337_s12  ;;  %s855_s12 = sshll.u32 %s389_s21, 4  ;;  %s1549_s12 = int_to_ptr.vmem [resolvable:$true] %s855_s12 }
 0x2dd   : > { %s1234_s18 = scalar_lea.vmem %s1549_s12, 128  ;;  %p1241_p4 = scmp.lt.s32.totalorder %s1549_s12, %s1239_s28 }
 0x2de   : > { %p1235_p0 = scmp.ne.s32.totalorder %s1549_s12, %s1234_s18 }
 0x2e0   : > { %718 = vrot.lane.b32.xlu1 %v707_v16, %s1338_s23  ;;  %p1236_p1 = pnand %p1235_p0, %p1433_p3 }
 0x2e2   : > { %p1237_p2 = pneg %p1236_p1 }
 0x346   : > { %v711_v19 = vpop.permute.xlu0 %710 }
 0x34a   : > { %v717_v22 = vpop.permute.xlu0 %716 }
 0x34b   : > { %v723_v23 = vsel %vm722_vm12, %v711_v19, %v717_v22 }
 0x34c   : > { %v731_v24 = vsel %vm729_vm13, %v723_v23, %v706_v11 }
 0x34d   : > { %v733_v25 = vadd.f32 %v731_v24, %v533_v20 }
 0x34e   : > { %v713_v27 = vpop.permute.xlu1 %712 }
 0x34f   : > { %v736_v28 = vsel %vm735_vm14, %v733_v25, -inf }
 0x350   : > { %737 = vmax.xlane.f32.xlu0 %v736_v28 }
 0x352   : > { %v719_v29 = vpop.permute.xlu1 %718 }
 0x353   : > { %v724_v31 = vsel %vm722_vm12, %v713_v27, %v719_v29 }
 0x354   : > { %v732_v32 = vsel %vm730_vm15, %v724_v31, %v707_v16 }
 0x355   : > { %v734_v33 = vadd.f32 %v732_v32, %v534_v30 }
 0x357   : > { %v739_v34 = vsel %vm735_vm14, %v734_v33, -inf }
 0x358   : > { %740 = vmax.xlane.f32.xlu1 %v739_v34 }
 0x3d9   : > { %v738_v35 = vpop.xlane.xlu0 %737 }
 0x3da   : > { %v742_v36 = vsub.f32 %v733_v25, %v738_v35 }
 0x3dc   : > { %v744_v37 = vmul.f32 1.442695, %v742_v36 }
 0x3de   : > { %1226 = vpow2.f32 %v744_v37 }
 0x3e1   : > { %v741_v38 = vpop.xlane.xlu1 %740 }
 0x3e2   : > { %v743_v39 = vsub.f32 %v734_v33, %v741_v38 }
 0x3e4   : > { %v746_v40 = vmul.f32 1.442695, %v743_v39 }
 0x3e6   : > { %1228 = vpow2.f32 %v746_v40 }
 0x3eb   : > { %v1227_v41 = vpop.eup %1226 }
 0x3ec   : > { %v748_v42 = vsel %vm735_vm14, %v1227_v41, 0.0 }
 0x3ed   : > { %749 = vadd.xlane.f32.xlu0 %v748_v42 }
 0x3f3   : > { %v1229_v43 = vpop.eup %1228 }
 0x3f4   : > { %v751_v44 = vsel %vm735_vm14, %v1229_v43, 0.0 }
 0x3f5   : > { %752 = vadd.xlane.f32.xlu0 %v751_v44 }
 0x476   : > { %v750_v46 = vpop.xlane.xlu0 %749 }
 0x477   : > { %1230 = vrcp.f32 %v750_v46 }
 0x47e   : > { %v753_v47 = vpop.xlane.xlu0 %752 }
 0x47f   : > { %1232 = vrcp.f32 %v753_v47 }
 0x484   : > { %v1231_v48 = vpop.eup %1230 }
 0x485   : > { %v756_v49 = vmul.f32 %v1231_v48, %v1227_v41 }
 0x487   : > { %v1106_v50 = vpack.c.bf16 %v756_v49, %v756_v49 }
 0x489   : > { %767 = vst.msk [vmem:[%s389_s21] sm:$0xf] %vm766_vm0, %v1106_v50 }
 0x48c   : > { %v1233_v51 = vpop.eup %1232 }
 0x48d   : > { %v757_v52 = vmul.f32 %v1233_v51, %v1229_v43 }
 0x48f   : > { %v1107_v53 = vpack.c.bf16 %v757_v52, %v757_v52  ;;  %v758_v54 = vpack.c.bf16 %v757_v52, %v756_v49 }
 0x491   : > { %1134 = vmatmul.mubr.msk.bf16.vlgmr.msra.gmra.mxu0 %vm735_vm14, %v758_v54  ;;  %768 = vst.msk [vmem:[%s389_s21 + $0x4] sm:$0xf] %vm766_vm0, %v1107_v53  ;;  %s1240_s21 = scalar_lea.vmem %s1239_s28, 256 }
 0x492   : > { %p1242_p5 = scmp.lt.s32.totalorder %s1240_s21, %s1234_s18 }
 0x494   : > { %p1243_p6 = por %p1242_p5, %p1241_p4 }
 0x496   : > { %p1244_p7 = pnand %p1243_p6, %p1237_p2 }
 0x498   : > { %1247 = shalt.err (!%p1244_p7)
}
 0x499   : > { %s1248_s17 = scalar_lea.hbm %s1547_s13, 128  ;;  %s1252_s20 = scalar_lea.hbm %s1612_s6, 1024 }
 0x49a   : > { %p1249_p9 = scmp.ne.s32.totalorder %s1547_s13, %s1248_s17  ;;  %p1253_p12 = scmp.lt.s32.totalorder %s1547_s13, %s1612_s6 }
 0x49b   : > { %p1254_p13 = scmp.lt.s32.totalorder %s1252_s20, %s1248_s17 }
 0x49c   : > { %p1250_p10 = pnand %p1249_p9, %p1433_p3 }
 0x49d   : > { %p1255_p0 = por %p1254_p13, %p1253_p12 }
 0x49e   : > { %p1251_p11 = pneg %p1250_p10 }
 0x4a0   : > { %p1256_p1 = pnand %p1255_p0, %p1251_p11 }
 0x4a2   : > { %1259 = shalt.err (!%p1256_p1)
}
 0x4a3   : > { %s1340_s9 = smov 64   ;;  %s1341_s18 = smov 4   ;;  %vm827_vm1 = vcmask 257024  }
 0x4a4   : > { %1138 = dma.vmem_to_hbm [thread:$0]  (%p1433_p3), %s1549_s12, 128, %s1547_s13, %s1551_s16, %s1340_s9, %s1340_s9, %s1341_s18  }
 0x4a5   : > { %s449_s21 = scalar_lea.vmem %s1613_s7, %s1477_s30 }
 0x551   : > { %v812_v55 = vpop.f32.mrf.mxu0 }
 0x552   : > { %v1108_v56 = vpack.c.bf16 %v812_v55, %v812_v55 }
 0x553   : > { %v1135_v57 = vpop.f32.mrf.mxu0 }
 0x554   : > { %828 = vst.msk [vmem:[%s449_s21] sm:$0xf] %vm827_vm1, %v1108_v56 }
 0x555   : > { %v815_v58 = vpop.f32.mrf.mxu0 }
 0x556   : > { %v1109_v59 = vpack.c.bf16 %v815_v58, %v815_v58 }
 0x557   : > { %v1136_v60 = vpop.f32.mrf.mxu0 }
 0x558   : > { %829 = vst.msk [vmem:[%s449_s21 + $0x4] sm:$0xf] %vm827_vm1, %v1109_v59 }
 0x559 PF: > { %p1144_p2 = scmp.ge.s32.totalorder %s1326_s8, 2  ;;  %s873_s14 = sand.u32 1, %s1298_s24  }
 0x55a   : > { %s874_s12 = scalar_lea.sflag [#allocation3], %s873_s14 }
 0x55b   : > { %p1141_p3 = pnand %p1144_p2, %p1442_p8 }
 0x55d   : > { %p1142_p4 = pneg %p1141_p3 }
 0x55f   : > { %1293 = dma.done.wait (%p1142_p4), %s874_s12, 128  }
 0x560   : > { %1295 = vsyncadd (%p1142_p4), %s874_s12, 4294967168  ;;  %s21_s8 = sadd.s32 1, %s1326_s8   ;;  %s1622_s28 = sld [smem:[#allocation5_spill]] }
 0x561   : > { %p18_p5 = scmp.ge.s32.totalorder %s21_s8, 10   ;;  %s1623_s30 = sld [smem:[#allocation6_spill]] }
 0x562   : > { %s1624_s13 = sld [smem:[#allocation7_spill]]  ;;  %s1625_s24 = smov %s1302_s25 }
 0x563   : > { %s1626_s25 = smov %s1306_s26  ;;  %s1627_s26 = smov %s1451_s19 }
 0x564   : > { %s1628_s27 = smov %s1318_s29  ;;  %20 = sbr.rel (!%p18_p5) target bundleno = 5 (0x5), region = 106 }
 0x567   : > { %s1629_s29 = smov %s1623_s30 }
 0x568   : > { %s1630_s30 = smov %s1624_s13 }
 0x569   :  { %891 = vsyncpa [#allocation3], 1 }
 0x56a   :  { %893 = vsyncpa [#allocation3 + $0x1], 1 }

</bundles_post_ra>
